<compile_context>
chip_gen: v7x
topology: tpu7x:2x2x1
jax: 0.10.0
libtpu: 0.0.40
codegen_flags: <defaults>
</compile_context>

<pallas_src>
import functools

import jax
import jax.numpy as jnp
from jax.experimental import pallas as pl
from jax.experimental.pallas import tpu as pltpu


def _round_up(x, m):
    return (x + m - 1) // m * m


def _spatial_attention_kernel(x_ref, w_ref, out_ref, sum_ref, max_ref, pad_ref,
                              *, ksize, channels):
    # x_ref:   (1, TC, H, W)   one (batch, channel-tile) block, NCHW (W on lanes)
    # w_ref:   (2*K*K,) SMEM   flattened conv weight, (in_ch, kh, kw) order
    # out_ref: (1, 1, H, W)    sigmoid(conv([mean_C, max_C]))
    # sum_ref: (H, W) VMEM     running channel sum   (persists across C blocks)
    # max_ref: (H, W) VMEM     running channel max   (persists across C blocks)
    # pad_ref: (2, H+2P, Wp)   zero-padded stats maps; interior lane-aligned at lane 0
    K = ksize
    P = K // 2
    H = x_ref.shape[2]
    W = x_ref.shape[3]
    Wp = pad_ref.shape[2]            # round_up(W + 2P, 128)
    Wn = _round_up(W, 128)           # trimmed conv/sigmoid lane width
    Hr = H + 2 * P

    c_idx = pl.program_id(1)
    last_c = pl.num_programs(1) - 1

    # ---- partial channel reduction for this (1, TC, H, W) block -----------------
    xb = x_ref[0].astype(jnp.float32)             # (TC, H, W)
    blk_sum = jnp.sum(xb, axis=0)                 # (H, W) lane-dense VPU adds
    blk_max = jnp.max(xb, axis=0)                 # (H, W)

    @pl.when(c_idx == 0)
    def _init():
        sum_ref[...] = blk_sum
        max_ref[...] = blk_max

    @pl.when(c_idx != 0)
    def _accum():
        sum_ref[...] = sum_ref[...] + blk_sum
        max_ref[...] = jnp.maximum(max_ref[...], blk_max)

    # ---- finalize: halo pad, KxK 'same' conv (2 -> 1, no bias), sigmoid ---------
    @pl.when(c_idx == last_c)
    def _finalize():
        mean_c = sum_ref[...] * (1.0 / channels)
        max_c = max_ref[...]

        # Zero only the halo strips, then store the interior lane-aligned at lane 0
        # (unmasked vst); the left pad is folded into the roll shift below.
        for ch, stat in ((0, mean_c), (1, max_c)):
            if P > 0:
                pad_ref[ch, 0:P, :] = jnp.zeros((P, Wp), jnp.float32)
                pad_ref[ch, P + H:Hr, :] = jnp.zeros((P, Wp), jnp.float32)
            if Wp > W:
                pad_ref[ch, P:P + H, W:Wp] = jnp.zeros((H, Wp - W), jnp.float32)
            pad_ref[ch, P:P + H, 0:W] = stat

        # out[h, w] = sum_{c, kh, kw} wgt[c, kh, kw] * padded[c, h + kh, w + kw]
        # Per (c, kh): one sublane slab; per kw: a lane roll by (P - kw) mod Wp (XLU)
        # and a scalar FMA (VPU) on Wn lanes only.  Wrapped lanes read the zero tail
        # since Wp - W >= 2P, so the 'same'-padding semantics are exact.
        acc = jnp.zeros((H, Wn), jnp.float32)
        for ch in range(2):
            for kh in range(K):
                slab = pad_ref[ch, kh:kh + H, :]                  # (H, Wp)
                for kw in range(K):
                    wv = w_ref[ch * K * K + kh * K + kw]
                    shift = (P - kw) % Wp
                    shifted = slab if shift == 0 else pltpu.roll(slab, shift, axis=1)
                    acc = acc + wv * shifted[:, 0:Wn]

        out_ref[0, 0] = jax.nn.sigmoid(acc[:, 0:W]).astype(out_ref.dtype)


def _pick_channel_tile(C, H, W, target_bytes=1 << 20):
    """Largest divisor of C whose (TC, H, W) f32 block stays under target_bytes."""
    best = 1
    for tc in range(1, C + 1):
        if C % tc == 0 and tc * H * W * 4 <= target_bytes:
            best = tc
    return best


def spatial_attention(x, wconv, *, kernel_size=7, channel_tile=None):
    """x: (N, C, H, W) f32; wconv: (1, 2, K, K) = Conv2d(2, 1, K, 'same', bias=False).weight."""
    N, C, H, W = x.shape
    K = kernel_size
    assert K % 2 == 1, "kernel_size must be odd to match symmetric 'same' padding"
    P = K // 2
    Wp = _round_up(W + 2 * P, 128)
    Hr = H + 2 * P

    TC = channel_tile if channel_tile is not None else _pick_channel_tile(C, H, W)
    assert C % TC == 0, "channel_tile must divide C"
    cblocks = C // TC

    w_flat = wconv.reshape(-1).astype(jnp.float32)        # (2*K*K,), (c, kh, kw) order

    # VMEM budget: double-buffered in/out blocks + persistent scratch, with headroom.
    est = (2 * (TC * H * W + H * W) + 2 * H * W + 2 * Hr * Wp) * 4
    vmem_limit = max(32 * 1024 * 1024, min(64 * 1024 * 1024, 4 * est))

    kernel = functools.partial(_spatial_attention_kernel, ksize=K, channels=C)
    return pl.pallas_call(
        kernel,
        out_shape=jax.ShapeDtypeStruct((N, 1, H, W), jnp.float32),
        grid=(N, cblocks),
        in_specs=[
            pl.BlockSpec((1, TC, H, W), lambda n, c: (n, c, 0, 0)),
            pl.BlockSpec(memory_space=pltpu.MemorySpace.SMEM),
        ],
        out_specs=pl.BlockSpec((1, 1, H, W), lambda n, c: (n, 0, 0, 0)),
        scratch_shapes=[
            pltpu.VMEM((H, W), jnp.float32),       # running channel sum
            pltpu.VMEM((H, W), jnp.float32),       # running channel max
            pltpu.VMEM((2, Hr, Wp), jnp.float32),  # zero-padded 2-channel stats
        ],
        compiler_params=pltpu.CompilerParams(
            dimension_semantics=("parallel", "arbitrary"),
            vmem_limit_bytes=vmem_limit,
        ),
    )(x, w_flat)


# ---------------- pure-JAX reference (matches the PyTorch module) ----------------
def spatial_attention_reference(x, wconv):
    avg = jnp.mean(x, axis=1, keepdims=True)
    mx = jnp.max(x, axis=1, keepdims=True)
    x2 = jnp.concatenate([avg, mx], axis=1)                       # (N, 2, H, W)
    conv = jax.lax.conv_general_dilated(
        x2, wconv, window_strides=(1, 1), padding="SAME",
        dimension_numbers=("NCHW", "OIHW", "NCHW"))
    return jax.nn.sigmoid(conv)


if __name__ == "__main__":
    key = jax.random.PRNGKey(0)

    configs = [
        # (N, C, H, W, K, channel_tile)
        (2, 8, 16, 32, 7, 2),       # multi-step channel reduction, W < 128 (masked tail)
        (1, 12, 8, 128, 3, None),   # single-step reduction, lane-dense W, K=3
    ]
    for N, C, H, W, K, tc in configs:
        key, k1, k2 = jax.random.split(key, 3)
        x = jax.random.normal(k1, (N, C, H, W), dtype=jnp.float32)
        # deterministic synthetic Conv2d(2, 1, K, padding='same', bias=False) weight
        wconv = 0.1 * jax.random.normal(k2, (1, 2, K, K), dtype=jnp.float32)

        run = jax.jit(functools.partial(spatial_attention, kernel_size=K, channel_tile=tc))
        out = jax.block_until_ready(run(x, wconv))

        ref = spatial_attention_reference(x, wconv)
        err = float(jnp.max(jnp.abs(out - ref)))
        if err > 1e-4:
            raise AssertionError(
                f"mismatch vs reference (N={N},C={C},H={H},W={W},K={K}): max abs err {err}")

    print("KERNEL_OK")
</pallas_src>

<mosaic_0001>
module attributes {stable_mosaic.version = 11 : i64} {
  func.func @_spatial_attention_kernel(%arg0: i32, %arg1: i32, %arg2: memref<1x2x16x32xf32, #tpu.memory_space<vmem>>, %arg3: memref<98xf32, #tpu.memory_space<smem>>, %arg4: memref<1x1x16x32xf32, #tpu.memory_space<vmem>>, %arg5: memref<16x32xf32, #tpu.memory_space<vmem>>, %arg6: memref<16x32xf32, #tpu.memory_space<vmem>>, %arg7: memref<2x22x128xf32, #tpu.memory_space<vmem>>) attributes {dimension_semantics = [#tpu.dimension_semantics<parallel>, #tpu.dimension_semantics<arbitrary>], iteration_bounds = array<i64: 2, 4>, scalar_prefetch = 0 : i64, scratch_operands = 3 : i64, tpu.core_type = #tpu.core_type<tc>, window_params = [{transform_indices = @transform_0, window_bounds = array<i64: 1, 2, 16, 32>}, {transform_indices = @transform_1, window_bounds = array<i64: 98>}, {transform_indices = @transform_2, window_bounds = array<i64: 1, 1, 16, 32>}]} {
    %c0 = arith.constant 0 : index
    %c0_0 = arith.constant 0 : index
    %c0_1 = arith.constant 0 : index
    %c0_2 = arith.constant 0 : index
    %0 = vector.load %arg2[%c0, %c0_0, %c0_1, %c0_2] : memref<1x2x16x32xf32, #tpu.memory_space<vmem>>, vector<1x2x16x32xf32>
    %1 = vector.shape_cast %0 : vector<1x2x16x32xf32> to vector<2x16x32xf32>
    %cst = arith.constant dense<0.000000e+00> : vector<16x32xf32>
    %2 = vector.multi_reduction <add>, %1, %cst [0] : vector<2x16x32xf32> to vector<16x32xf32>
    %cst_3 = arith.constant dense<0xFF800000> : vector<16x32xf32>
    %3 = vector.multi_reduction <maximumf>, %1, %cst_3 [0] : vector<2x16x32xf32> to vector<16x32xf32>
    %c0_i32 = arith.constant 0 : i32
    %4 = arith.cmpi eq, %arg1, %c0_i32 : i32
    %5 = arith.extui %4 : i1 to i32
    %c0_i32_4 = arith.constant 0 : i32
    %6 = arith.cmpi ne, %5, %c0_i32_4 : i32
    scf.if %6 {
      %c0_8 = arith.constant 0 : index
      %c0_9 = arith.constant 0 : index
      %13 = vector.load %arg5[%c0_8, %c0_9] : memref<16x32xf32, #tpu.memory_space<vmem>>, vector<16x32xf32>
      tpu.vector_store %arg5[%c0_8, %c0_9], %2 {strides = array<i32>} : memref<16x32xf32, #tpu.memory_space<vmem>>, vector<16x32xf32>,
      %c0_10 = arith.constant 0 : index
      %c0_11 = arith.constant 0 : index
      %14 = vector.load %arg6[%c0_10, %c0_11] : memref<16x32xf32, #tpu.memory_space<vmem>>, vector<16x32xf32>
      tpu.vector_store %arg6[%c0_10, %c0_11], %3 {strides = array<i32>} : memref<16x32xf32, #tpu.memory_space<vmem>>, vector<16x32xf32>,
    } else {
    }
    %c0_i32_5 = arith.constant 0 : i32
    %7 = arith.cmpi ne, %arg1, %c0_i32_5 : i32
    %8 = arith.extui %7 : i1 to i32
    %c0_i32_6 = arith.constant 0 : i32
    %9 = arith.cmpi ne, %8, %c0_i32_6 : i32
    scf.if %9 {
      %c0_8 = arith.constant 0 : index
      %c0_9 = arith.constant 0 : index
      %13 = vector.load %arg5[%c0_8, %c0_9] : memref<16x32xf32, #tpu.memory_space<vmem>>, vector<16x32xf32>
      %14 = arith.addf %13, %2 : vector<16x32xf32>
      %c0_10 = arith.constant 0 : index
      %c0_11 = arith.constant 0 : index
      %15 = vector.load %arg5[%c0_10, %c0_11] : memref<16x32xf32, #tpu.memory_space<vmem>>, vector<16x32xf32>
      tpu.vector_store %arg5[%c0_10, %c0_11], %14 {strides = array<i32>} : memref<16x32xf32, #tpu.memory_space<vmem>>, vector<16x32xf32>,
      %c0_12 = arith.constant 0 : index
      %c0_13 = arith.constant 0 : index
      %16 = vector.load %arg6[%c0_12, %c0_13] : memref<16x32xf32, #tpu.memory_space<vmem>>, vector<16x32xf32>
      %17 = arith.maximumf %16, %3 : vector<16x32xf32>
      %c0_14 = arith.constant 0 : index
      %c0_15 = arith.constant 0 : index
      %18 = vector.load %arg6[%c0_14, %c0_15] : memref<16x32xf32, #tpu.memory_space<vmem>>, vector<16x32xf32>
      tpu.vector_store %arg6[%c0_14, %c0_15], %17 {strides = array<i32>} : memref<16x32xf32, #tpu.memory_space<vmem>>, vector<16x32xf32>,
    } else {
    }
    %c3_i32 = arith.constant 3 : i32
    %10 = arith.cmpi eq, %arg1, %c3_i32 : i32
    %11 = arith.extui %10 : i1 to i32
    %c0_i32_7 = arith.constant 0 : i32
    %12 = arith.cmpi ne, %11, %c0_i32_7 : i32
    scf.if %12 {
      %c0_8 = arith.constant 0 : index
      %c0_9 = arith.constant 0 : index
      %13 = vector.load %arg5[%c0_8, %c0_9] : memref<16x32xf32, #tpu.memory_space<vmem>>, vector<16x32xf32>
      %cst_10 = arith.constant 1.250000e-01 : f32
      %14 = vector.broadcast %cst_10 : f32 to vector<16x32xf32>
      %15 = arith.mulf %13, %14 : vector<16x32xf32>
      %c0_11 = arith.constant 0 : index
      %c0_12 = arith.constant 0 : index
      %16 = vector.load %arg6[%c0_11, %c0_12] : memref<16x32xf32, #tpu.memory_space<vmem>>, vector<16x32xf32>
      %cst_13 = arith.constant 0.000000e+00 : f32
      %17 = vector.broadcast %cst_13 : f32 to vector<3x128xf32>
      %c0_14 = arith.constant 0 : index
      %c0_15 = arith.constant 0 : index
      %c0_16 = arith.constant 0 : index
      %18 = vector.load %arg7[%c0_14, %c0_15, %c0_16] : memref<2x22x128xf32, #tpu.memory_space<vmem>>, vector<1x3x128xf32>
      %19 = vector.shape_cast %18 : vector<1x3x128xf32> to vector<3x128xf32>
      %20 = vector.shape_cast %17 : vector<3x128xf32> to vector<1x3x128xf32>
      tpu.vector_store %arg7[%c0_14, %c0_15, %c0_16], %20 {strides = array<i32>} : memref<2x22x128xf32, #tpu.memory_space<vmem>>, vector<1x3x128xf32>,
      %cst_17 = arith.constant 0.000000e+00 : f32
      %21 = vector.broadcast %cst_17 : f32 to vector<3x128xf32>
      %c0_18 = arith.constant 0 : index
      %c19 = arith.constant 19 : index
      %c0_19 = arith.constant 0 : index
      %22 = vector.load %arg7[%c0_18, %c19, %c0_19] : memref<2x22x128xf32, #tpu.memory_space<vmem>>, vector<1x3x128xf32>
      %23 = vector.shape_cast %22 : vector<1x3x128xf32> to vector<3x128xf32>
      %24 = vector.shape_cast %21 : vector<3x128xf32> to vector<1x3x128xf32>
      tpu.vector_store %arg7[%c0_18, %c19, %c0_19], %24 {strides = array<i32>} : memref<2x22x128xf32, #tpu.memory_space<vmem>>, vector<1x3x128xf32>,
      %cst_20 = arith.constant 0.000000e+00 : f32
      %25 = vector.broadcast %cst_20 : f32 to vector<16x96xf32>
      %c0_21 = arith.constant 0 : index
      %c3 = arith.constant 3 : index
      %c32 = arith.constant 32 : index
      %26 = vector.load %arg7[%c0_21, %c3, %c32] : memref<2x22x128xf32, #tpu.memory_space<vmem>>, vector<1x16x96xf32>
      %27 = vector.shape_cast %26 : vector<1x16x96xf32> to vector<16x96xf32>
      %28 = vector.shape_cast %25 : vector<16x96xf32> to vector<1x16x96xf32>
      tpu.vector_store %arg7[%c0_21, %c3, %c32], %28 {strides = array<i32>} : memref<2x22x128xf32, #tpu.memory_space<vmem>>, vector<1x16x96xf32>,
      %c0_22 = arith.constant 0 : index
      %c3_23 = arith.constant 3 : index
      %c0_24 = arith.constant 0 : index
      %29 = vector.load %arg7[%c0_22, %c3_23, %c0_24] : memref<2x22x128xf32, #tpu.memory_space<vmem>>, vector<1x16x32xf32>
      %30 = vector.shape_cast %29 : vector<1x16x32xf32> to vector<16x32xf32>
      %31 = vector.shape_cast %15 : vector<16x32xf32> to vector<1x16x32xf32>
      tpu.vector_store %arg7[%c0_22, %c3_23, %c0_24], %31 {strides = array<i32>} : memref<2x22x128xf32, #tpu.memory_space<vmem>>, vector<1x16x32xf32>,
      %cst_25 = arith.constant 0.000000e+00 : f32
      %32 = vector.broadcast %cst_25 : f32 to vector<3x128xf32>
      %c1 = arith.constant 1 : index
      %c0_26 = arith.constant 0 : index
      %c0_27 = arith.constant 0 : index
      %33 = vector.load %arg7[%c1, %c0_26, %c0_27] : memref<2x22x128xf32, #tpu.memory_space<vmem>>, vector<1x3x128xf32>
      %34 = vector.shape_cast %33 : vector<1x3x128xf32> to vector<3x128xf32>
      %35 = vector.shape_cast %32 : vector<3x128xf32> to vector<1x3x128xf32>
      tpu.vector_store %arg7[%c1, %c0_26, %c0_27], %35 {strides = array<i32>} : memref<2x22x128xf32, #tpu.memory_space<vmem>>, vector<1x3x128xf32>,
      %cst_28 = arith.constant 0.000000e+00 : f32
      %36 = vector.broadcast %cst_28 : f32 to vector<3x128xf32>
      %c1_29 = arith.constant 1 : index
      %c19_30 = arith.constant 19 : index
      %c0_31 = arith.constant 0 : index
      %37 = vector.load %arg7[%c1_29, %c19_30, %c0_31] : memref<2x22x128xf32, #tpu.memory_space<vmem>>, vector<1x3x128xf32>
      %38 = vector.shape_cast %37 : vector<1x3x128xf32> to vector<3x128xf32>
      %39 = vector.shape_cast %36 : vector<3x128xf32> to vector<1x3x128xf32>
      tpu.vector_store %arg7[%c1_29, %c19_30, %c0_31], %39 {strides = array<i32>} : memref<2x22x128xf32, #tpu.memory_space<vmem>>, vector<1x3x128xf32>,
      %cst_32 = arith.constant 0.000000e+00 : f32
      %40 = vector.broadcast %cst_32 : f32 to vector<16x96xf32>
      %c1_33 = arith.constant 1 : index
      %c3_34 = arith.constant 3 : index
      %c32_35 = arith.constant 32 : index
      %41 = vector.load %arg7[%c1_33, %c3_34, %c32_35] : memref<2x22x128xf32, #tpu.memory_space<vmem>>, vector<1x16x96xf32>
      %42 = vector.shape_cast %41 : vector<1x16x96xf32> to vector<16x96xf32>
      %43 = vector.shape_cast %40 : vector<16x96xf32> to vector<1x16x96xf32>
      tpu.vector_store %arg7[%c1_33, %c3_34, %c32_35], %43 {strides = array<i32>} : memref<2x22x128xf32, #tpu.memory_space<vmem>>, vector<1x16x96xf32>,
      %c1_36 = arith.constant 1 : index
      %c3_37 = arith.constant 3 : index
      %c0_38 = arith.constant 0 : index
      %44 = vector.load %arg7[%c1_36, %c3_37, %c0_38] : memref<2x22x128xf32, #tpu.memory_space<vmem>>, vector<1x16x32xf32>
      %45 = vector.shape_cast %44 : vector<1x16x32xf32> to vector<16x32xf32>
      %46 = vector.shape_cast %16 : vector<16x32xf32> to vector<1x16x32xf32>
      tpu.vector_store %arg7[%c1_36, %c3_37, %c0_38], %46 {strides = array<i32>} : memref<2x22x128xf32, #tpu.memory_space<vmem>>, vector<1x16x32xf32>,
      %cst_39 = arith.constant 0.000000e+00 : f32
      %47 = vector.broadcast %cst_39 : f32 to vector<16x128xf32>
      %c0_40 = arith.constant 0 : index
      %c0_41 = arith.constant 0 : index
      %c0_42 = arith.constant 0 : index
      %48 = vector.load %arg7[%c0_40, %c0_41, %c0_42] : memref<2x22x128xf32, #tpu.memory_space<vmem>>, vector<1x16x128xf32>
      %49 = vector.shape_cast %48 : vector<1x16x128xf32> to vector<16x128xf32>
      %c0_43 = arith.constant 0 : index
      %50 = memref.load %arg3[%c0_43] : memref<98xf32, #tpu.memory_space<smem>>
      %c3_i32_44 = arith.constant 3 : i32
      %51 = tpu.dynamic_rotate %49 by %c3_i32_44 dim 1 : vector<16x128xf32>, i32 -> vector<16x128xf32>
      %52 = vector.broadcast %50 : f32 to vector<16x128xf32>
      %53 = arith.mulf %52, %51 : vector<16x128xf32>
      %54 = arith.addf %47, %53 : vector<16x128xf32>
      %c1_45 = arith.constant 1 : index
      %55 = memref.load %arg3[%c1_45] : memref<98xf32, #tpu.memory_space<smem>>
      %c2_i32 = arith.constant 2 : i32
      %56 = tpu.dynamic_rotate %49 by %c2_i32 dim 1 : vector<16x128xf32>, i32 -> vector<16x128xf32>
      %57 = vector.broadcast %55 : f32 to vector<16x128xf32>
      %58 = arith.mulf %57, %56 : vector<16x128xf32>
      %59 = arith.addf %54, %58 : vector<16x128xf32>
      %c2 = arith.constant 2 : index
      %60 = memref.load %arg3[%c2] : memref<98xf32, #tpu.memory_space<smem>>
      %c1_i32 = arith.constant 1 : i32
      %61 = tpu.dynamic_rotate %49 by %c1_i32 dim 1 : vector<16x128xf32>, i32 -> vector<16x128xf32>
      %62 = vector.broadcast %60 : f32 to vector<16x128xf32>
      %63 = arith.mulf %62, %61 : vector<16x128xf32>
      %64 = arith.addf %59, %63 : vector<16x128xf32>
      %c3_46 = arith.constant 3 : index
      %65 = memref.load %arg3[%c3_46] : memref<98xf32, #tpu.memory_space<smem>>
      %66 = vector.broadcast %65 : f32 to vector<16x128xf32>
      %67 = arith.mulf %66, %49 : vector<16x128xf32>
      %68 = arith.addf %64, %67 : vector<16x128xf32>
      %c4 = arith.constant 4 : index
      %69 = memref.load %arg3[%c4] : memref<98xf32, #tpu.memory_space<smem>>
      %c127_i32 = arith.constant 127 : i32
      %70 = tpu.dynamic_rotate %49 by %c127_i32 dim 1 : vector<16x128xf32>, i32 -> vector<16x128xf32>
      %71 = vector.broadcast %69 : f32 to vector<16x128xf32>
      %72 = arith.mulf %71, %70 : vector<16x128xf32>
      %73 = arith.addf %68, %72 : vector<16x128xf32>
      %c5 = arith.constant 5 : index
      %74 = memref.load %arg3[%c5] : memref<98xf32, #tpu.memory_space<smem>>
      %c126_i32 = arith.constant 126 : i32
      %75 = tpu.dynamic_rotate %49 by %c126_i32 dim 1 : vector<16x128xf32>, i32 -> vector<16x128xf32>
      %76 = vector.broadcast %74 : f32 to vector<16x128xf32>
      %77 = arith.mulf %76, %75 : vector<16x128xf32>
      %78 = arith.addf %73, %77 : vector<16x128xf32>
      %c6 = arith.constant 6 : index
      %79 = memref.load %arg3[%c6] : memref<98xf32, #tpu.memory_space<smem>>
      %c125_i32 = arith.constant 125 : i32
      %80 = tpu.dynamic_rotate %49 by %c125_i32 dim 1 : vector<16x128xf32>, i32 -> vector<16x128xf32>
      %81 = vector.broadcast %79 : f32 to vector<16x128xf32>
      %82 = arith.mulf %81, %80 : vector<16x128xf32>
      %83 = arith.addf %78, %82 : vector<16x128xf32>
      %c0_47 = arith.constant 0 : index
      %c1_48 = arith.constant 1 : index
      %c0_49 = arith.constant 0 : index
      %84 = vector.load %arg7[%c0_47, %c1_48, %c0_49] : memref<2x22x128xf32, #tpu.memory_space<vmem>>, vector<1x16x128xf32>
      %85 = vector.shape_cast %84 : vector<1x16x128xf32> to vector<16x128xf32>
      %c7 = arith.constant 7 : index
      %86 = memref.load %arg3[%c7] : memref<98xf32, #tpu.memory_space<smem>>
      %c3_i32_50 = arith.constant 3 : i32
      %87 = tpu.dynamic_rotate %85 by %c3_i32_50 dim 1 : vector<16x128xf32>, i32 -> vector<16x128xf32>
      %88 = vector.broadcast %86 : f32 to vector<16x128xf32>
      %89 = arith.mulf %88, %87 : vector<16x128xf32>
      %90 = arith.addf %83, %89 : vector<16x128xf32>
      %c8 = arith.constant 8 : index
      %91 = memref.load %arg3[%c8] : memref<98xf32, #tpu.memory_space<smem>>
      %c2_i32_51 = arith.constant 2 : i32
      %92 = tpu.dynamic_rotate %85 by %c2_i32_51 dim 1 : vector<16x128xf32>, i32 -> vector<16x128xf32>
      %93 = vector.broadcast %91 : f32 to vector<16x128xf32>
      %94 = arith.mulf %93, %92 : vector<16x128xf32>
      %95 = arith.addf %90, %94 : vector<16x128xf32>
      %c9 = arith.constant 9 : index
      %96 = memref.load %arg3[%c9] : memref<98xf32, #tpu.memory_space<smem>>
      %c1_i32_52 = arith.constant 1 : i32
      %97 = tpu.dynamic_rotate %85 by %c1_i32_52 dim 1 : vector<16x128xf32>, i32 -> vector<16x128xf32>
      %98 = vector.broadcast %96 : f32 to vector<16x128xf32>
      %99 = arith.mulf %98, %97 : vector<16x128xf32>
      %100 = arith.addf %95, %99 : vector<16x128xf32>
      %c10 = arith.constant 10 : index
      %101 = memref.load %arg3[%c10] : memref<98xf32, #tpu.memory_space<smem>>
      %102 = vector.broadcast %101 : f32 to vector<16x128xf32>
      %103 = arith.mulf %102, %85 : vector<16x128xf32>
      %104 = arith.addf %100, %103 : vector<16x128xf32>
      %c11 = arith.constant 11 : index
      %105 = memref.load %arg3[%c11] : memref<98xf32, #tpu.memory_space<smem>>
      %c127_i32_53 = arith.constant 127 : i32
      %106 = tpu.dynamic_rotate %85 by %c127_i32_53 dim 1 : vector<16x128xf32>, i32 -> vector<16x128xf32>
      %107 = vector.broadcast %105 : f32 to vector<16x128xf32>
      %108 = arith.mulf %107, %106 : vector<16x128xf32>
      %109 = arith.addf %104, %108 : vector<16x128xf32>
      %c12 = arith.constant 12 : index
      %110 = memref.load %arg3[%c12] : memref<98xf32, #tpu.memory_space<smem>>
      %c126_i32_54 = arith.constant 126 : i32
      %111 = tpu.dynamic_rotate %85 by %c126_i32_54 dim 1 : vector<16x128xf32>, i32 -> vector<16x128xf32>
      %112 = vector.broadcast %110 : f32 to vector<16x128xf32>
      %113 = arith.mulf %112, %111 : vector<16x128xf32>
      %114 = arith.addf %109, %113 : vector<16x128xf32>
      %c13 = arith.constant 13 : index
      %115 = memref.load %arg3[%c13] : memref<98xf32, #tpu.memory_space<smem>>
      %c125_i32_55 = arith.constant 125 : i32
      %116 = tpu.dynamic_rotate %85 by %c125_i32_55 dim 1 : vector<16x128xf32>, i32 -> vector<16x128xf32>
      %117 = vector.broadcast %115 : f32 to vector<16x128xf32>
      %118 = arith.mulf %117, %116 : vector<16x128xf32>
      %119 = arith.addf %114, %118 : vector<16x128xf32>
      %c0_56 = arith.constant 0 : index
      %c2_57 = arith.constant 2 : index
      %c0_58 = arith.constant 0 : index
      %120 = vector.load %arg7[%c0_56, %c2_57, %c0_58] : memref<2x22x128xf32, #tpu.memory_space<vmem>>, vector<1x16x128xf32>
      %121 = vector.shape_cast %120 : vector<1x16x128xf32> to vector<16x128xf32>
      %c14 = arith.constant 14 : index
      %122 = memref.load %arg3[%c14] : memref<98xf32, #tpu.memory_space<smem>>
      %c3_i32_59 = arith.constant 3 : i32
      %123 = tpu.dynamic_rotate %121 by %c3_i32_59 dim 1 : vector<16x128xf32>, i32 -> vector<16x128xf32>
      %124 = vector.broadcast %122 : f32 to vector<16x128xf32>
      %125 = arith.mulf %124, %123 : vector<16x128xf32>
      %126 = arith.addf %119, %125 : vector<16x128xf32>
      %c15 = arith.constant 15 : index
      %127 = memref.load %arg3[%c15] : memref<98xf32, #tpu.memory_space<smem>>
      %c2_i32_60 = arith.constant 2 : i32
      %128 = tpu.dynamic_rotate %121 by %c2_i32_60 dim 1 : vector<16x128xf32>, i32 -> vector<16x128xf32>
      %129 = vector.broadcast %127 : f32 to vector<16x128xf32>
      %130 = arith.mulf %129, %128 : vector<16x128xf32>
      %131 = arith.addf %126, %130 : vector<16x128xf32>
      %c16 = arith.constant 16 : index
      %132 = memref.load %arg3[%c16] : memref<98xf32, #tpu.memory_space<smem>>
      %c1_i32_61 = arith.constant 1 : i32
      %133 = tpu.dynamic_rotate %121 by %c1_i32_61 dim 1 : vector<16x128xf32>, i32 -> vector<16x128xf32>
      %134 = vector.broadcast %132 : f32 to vector<16x128xf32>
      %135 = arith.mulf %134, %133 : vector<16x128xf32>
      %136 = arith.addf %131, %135 : vector<16x128xf32>
      %c17 = arith.constant 17 : index
      %137 = memref.load %arg3[%c17] : memref<98xf32, #tpu.memory_space<smem>>
      %138 = vector.broadcast %137 : f32 to vector<16x128xf32>
      %139 = arith.mulf %138, %121 : vector<16x128xf32>
      %140 = arith.addf %136, %139 : vector<16x128xf32>
      %c18 = arith.constant 18 : index
      %141 = memref.load %arg3[%c18] : memref<98xf32, #tpu.memory_space<smem>>
      %c127_i32_62 = arith.constant 127 : i32
      %142 = tpu.dynamic_rotate %121 by %c127_i32_62 dim 1 : vector<16x128xf32>, i32 -> vector<16x128xf32>
      %143 = vector.broadcast %141 : f32 to vector<16x128xf32>
      %144 = arith.mulf %143, %142 : vector<16x128xf32>
      %145 = arith.addf %140, %144 : vector<16x128xf32>
      %c19_63 = arith.constant 19 : index
      %146 = memref.load %arg3[%c19_63] : memref<98xf32, #tpu.memory_space<smem>>
      %c126_i32_64 = arith.constant 126 : i32
      %147 = tpu.dynamic_rotate %121 by %c126_i32_64 dim 1 : vector<16x128xf32>, i32 -> vector<16x128xf32>
      %148 = vector.broadcast %146 : f32 to vector<16x128xf32>
      %149 = arith.mulf %148, %147 : vector<16x128xf32>
      %150 = arith.addf %145, %149 : vector<16x128xf32>
      %c20 = arith.constant 20 : index
      %151 = memref.load %arg3[%c20] : memref<98xf32, #tpu.memory_space<smem>>
      %c125_i32_65 = arith.constant 125 : i32
      %152 = tpu.dynamic_rotate %121 by %c125_i32_65 dim 1 : vector<16x128xf32>, i32 -> vector<16x128xf32>
      %153 = vector.broadcast %151 : f32 to vector<16x128xf32>
      %154 = arith.mulf %153, %152 : vector<16x128xf32>
      %155 = arith.addf %150, %154 : vector<16x128xf32>
      %c0_66 = arith.constant 0 : index
      %c3_67 = arith.constant 3 : index
      %c0_68 = arith.constant 0 : index
      %156 = vector.load %arg7[%c0_66, %c3_67, %c0_68] : memref<2x22x128xf32, #tpu.memory_space<vmem>>, vector<1x16x128xf32>
      %157 = vector.shape_cast %156 : vector<1x16x128xf32> to vector<16x128xf32>
      %c21 = arith.constant 21 : index
      %158 = memref.load %arg3[%c21] : memref<98xf32, #tpu.memory_space<smem>>
      %c3_i32_69 = arith.constant 3 : i32
      %159 = tpu.dynamic_rotate %157 by %c3_i32_69 dim 1 : vector<16x128xf32>, i32 -> vector<16x128xf32>
      %160 = vector.broadcast %158 : f32 to vector<16x128xf32>
      %161 = arith.mulf %160, %159 : vector<16x128xf32>
      %162 = arith.addf %155, %161 : vector<16x128xf32>
      %c22 = arith.constant 22 : index
      %163 = memref.load %arg3[%c22] : memref<98xf32, #tpu.memory_space<smem>>
      %c2_i32_70 = arith.constant 2 : i32
      %164 = tpu.dynamic_rotate %157 by %c2_i32_70 dim 1 : vector<16x128xf32>, i32 -> vector<16x128xf32>
      %165 = vector.broadcast %163 : f32 to vector<16x128xf32>
      %166 = arith.mulf %165, %164 : vector<16x128xf32>
      %167 = arith.addf %162, %166 : vector<16x128xf32>
      %c23 = arith.constant 23 : index
      %168 = memref.load %arg3[%c23] : memref<98xf32, #tpu.memory_space<smem>>
      %c1_i32_71 = arith.constant 1 : i32
      %169 = tpu.dynamic_rotate %157 by %c1_i32_71 dim 1 : vector<16x128xf32>, i32 -> vector<16x128xf32>
      %170 = vector.broadcast %168 : f32 to vector<16x128xf32>
      %171 = arith.mulf %170, %169 : vector<16x128xf32>
      %172 = arith.addf %167, %171 : vector<16x128xf32>
      %c24 = arith.constant 24 : index
      %173 = memref.load %arg3[%c24] : memref<98xf32, #tpu.memory_space<smem>>
      %174 = vector.broadcast %173 : f32 to vector<16x128xf32>
      %175 = arith.mulf %174, %157 : vector<16x128xf32>
      %176 = arith.addf %172, %175 : vector<16x128xf32>
      %c25 = arith.constant 25 : index
      %177 = memref.load %arg3[%c25] : memref<98xf32, #tpu.memory_space<smem>>
      %c127_i32_72 = arith.constant 127 : i32
      %178 = tpu.dynamic_rotate %157 by %c127_i32_72 dim 1 : vector<16x128xf32>, i32 -> vector<16x128xf32>
      %179 = vector.broadcast %177 : f32 to vector<16x128xf32>
      %180 = arith.mulf %179, %178 : vector<16x128xf32>
      %181 = arith.addf %176, %180 : vector<16x128xf32>
      %c26 = arith.constant 26 : index
      %182 = memref.load %arg3[%c26] : memref<98xf32, #tpu.memory_space<smem>>
      %c126_i32_73 = arith.constant 126 : i32
      %183 = tpu.dynamic_rotate %157 by %c126_i32_73 dim 1 : vector<16x128xf32>, i32 -> vector<16x128xf32>
      %184 = vector.broadcast %182 : f32 to vector<16x128xf32>
      %185 = arith.mulf %184, %183 : vector<16x128xf32>
      %186 = arith.addf %181, %185 : vector<16x128xf32>
      %c27 = arith.constant 27 : index
      %187 = memref.load %arg3[%c27] : memref<98xf32, #tpu.memory_space<smem>>
      %c125_i32_74 = arith.constant 125 : i32
      %188 = tpu.dynamic_rotate %157 by %c125_i32_74 dim 1 : vector<16x128xf32>, i32 -> vector<16x128xf32>
      %189 = vector.broadcast %187 : f32 to vector<16x128xf32>
      %190 = arith.mulf %189, %188 : vector<16x128xf32>
      %191 = arith.addf %186, %190 : vector<16x128xf32>
      %c0_75 = arith.constant 0 : index
      %c4_76 = arith.constant 4 : index
      %c0_77 = arith.constant 0 : index
      %192 = vector.load %arg7[%c0_75, %c4_76, %c0_77] : memref<2x22x128xf32, #tpu.memory_space<vmem>>, vector<1x16x128xf32>
      %193 = vector.shape_cast %192 : vector<1x16x128xf32> to vector<16x128xf32>
      %c28 = arith.constant 28 : index
      %194 = memref.load %arg3[%c28] : memref<98xf32, #tpu.memory_space<smem>>
      %c3_i32_78 = arith.constant 3 : i32
      %195 = tpu.dynamic_rotate %193 by %c3_i32_78 dim 1 : vector<16x128xf32>, i32 -> vector<16x128xf32>
      %196 = vector.broadcast %194 : f32 to vector<16x128xf32>
      %197 = arith.mulf %196, %195 : vector<16x128xf32>
      %198 = arith.addf %191, %197 : vector<16x128xf32>
      %c29 = arith.constant 29 : index
      %199 = memref.load %arg3[%c29] : memref<98xf32, #tpu.memory_space<smem>>
      %c2_i32_79 = arith.constant 2 : i32
      %200 = tpu.dynamic_rotate %193 by %c2_i32_79 dim 1 : vector<16x128xf32>, i32 -> vector<16x128xf32>
      %201 = vector.broadcast %199 : f32 to vector<16x128xf32>
      %202 = arith.mulf %201, %200 : vector<16x128xf32>
      %203 = arith.addf %198, %202 : vector<16x128xf32>
      %c30 = arith.constant 30 : index
      %204 = memref.load %arg3[%c30] : memref<98xf32, #tpu.memory_space<smem>>
      %c1_i32_80 = arith.constant 1 : i32
      %205 = tpu.dynamic_rotate %193 by %c1_i32_80 dim 1 : vector<16x128xf32>, i32 -> vector<16x128xf32>
      %206 = vector.broadcast %204 : f32 to vector<16x128xf32>
      %207 = arith.mulf %206, %205 : vector<16x128xf32>
      %208 = arith.addf %203, %207 : vector<16x128xf32>
      %c31 = arith.constant 31 : index
      %209 = memref.load %arg3[%c31] : memref<98xf32, #tpu.memory_space<smem>>
      %210 = vector.broadcast %209 : f32 to vector<16x128xf32>
      %211 = arith.mulf %210, %193 : vector<16x128xf32>
      %212 = arith.addf %208, %211 : vector<16x128xf32>
      %c32_81 = arith.constant 32 : index
      %213 = memref.load %arg3[%c32_81] : memref<98xf32, #tpu.memory_space<smem>>
      %c127_i32_82 = arith.constant 127 : i32
      %214 = tpu.dynamic_rotate %193 by %c127_i32_82 dim 1 : vector<16x128xf32>, i32 -> vector<16x128xf32>
      %215 = vector.broadcast %213 : f32 to vector<16x128xf32>
      %216 = arith.mulf %215, %214 : vector<16x128xf32>
      %217 = arith.addf %212, %216 : vector<16x128xf32>
      %c33 = arith.constant 33 : index
      %218 = memref.load %arg3[%c33] : memref<98xf32, #tpu.memory_space<smem>>
      %c126_i32_83 = arith.constant 126 : i32
      %219 = tpu.dynamic_rotate %193 by %c126_i32_83 dim 1 : vector<16x128xf32>, i32 -> vector<16x128xf32>
      %220 = vector.broadcast %218 : f32 to vector<16x128xf32>
      %221 = arith.mulf %220, %219 : vector<16x128xf32>
      %222 = arith.addf %217, %221 : vector<16x128xf32>
      %c34 = arith.constant 34 : index
      %223 = memref.load %arg3[%c34] : memref<98xf32, #tpu.memory_space<smem>>
      %c125_i32_84 = arith.constant 125 : i32
      %224 = tpu.dynamic_rotate %193 by %c125_i32_84 dim 1 : vector<16x128xf32>, i32 -> vector<16x128xf32>
      %225 = vector.broadcast %223 : f32 to vector<16x128xf32>
      %226 = arith.mulf %225, %224 : vector<16x128xf32>
      %227 = arith.addf %222, %226 : vector<16x128xf32>
      %c0_85 = arith.constant 0 : index
      %c5_86 = arith.constant 5 : index
      %c0_87 = arith.constant 0 : index
      %228 = vector.load %arg7[%c0_85, %c5_86, %c0_87] : memref<2x22x128xf32, #tpu.memory_space<vmem>>, vector<1x16x128xf32>
      %229 = vector.shape_cast %228 : vector<1x16x128xf32> to vector<16x128xf32>
      %c35 = arith.constant 35 : index
      %230 = memref.load %arg3[%c35] : memref<98xf32, #tpu.memory_space<smem>>
      %c3_i32_88 = arith.constant 3 : i32
      %231 = tpu.dynamic_rotate %229 by %c3_i32_88 dim 1 : vector<16x128xf32>, i32 -> vector<16x128xf32>
      %232 = vector.broadcast %230 : f32 to vector<16x128xf32>
      %233 = arith.mulf %232, %231 : vector<16x128xf32>
      %234 = arith.addf %227, %233 : vector<16x128xf32>
      %c36 = arith.constant 36 : index
      %235 = memref.load %arg3[%c36] : memref<98xf32, #tpu.memory_space<smem>>
      %c2_i32_89 = arith.constant 2 : i32
      %236 = tpu.dynamic_rotate %229 by %c2_i32_89 dim 1 : vector<16x128xf32>, i32 -> vector<16x128xf32>
      %237 = vector.broadcast %235 : f32 to vector<16x128xf32>
      %238 = arith.mulf %237, %236 : vector<16x128xf32>
      %239 = arith.addf %234, %238 : vector<16x128xf32>
      %c37 = arith.constant 37 : index
      %240 = memref.load %arg3[%c37] : memref<98xf32, #tpu.memory_space<smem>>
      %c1_i32_90 = arith.constant 1 : i32
      %241 = tpu.dynamic_rotate %229 by %c1_i32_90 dim 1 : vector<16x128xf32>, i32 -> vector<16x128xf32>
      %242 = vector.broadcast %240 : f32 to vector<16x128xf32>
      %243 = arith.mulf %242, %241 : vector<16x128xf32>
      %244 = arith.addf %239, %243 : vector<16x128xf32>
      %c38 = arith.constant 38 : index
      %245 = memref.load %arg3[%c38] : memref<98xf32, #tpu.memory_space<smem>>
      %246 = vector.broadcast %245 : f32 to vector<16x128xf32>
      %247 = arith.mulf %246, %229 : vector<16x128xf32>
      %248 = arith.addf %244, %247 : vector<16x128xf32>
      %c39 = arith.constant 39 : index
      %249 = memref.load %arg3[%c39] : memref<98xf32, #tpu.memory_space<smem>>
      %c127_i32_91 = arith.constant 127 : i32
      %250 = tpu.dynamic_rotate %229 by %c127_i32_91 dim 1 : vector<16x128xf32>, i32 -> vector<16x128xf32>
      %251 = vector.broadcast %249 : f32 to vector<16x128xf32>
      %252 = arith.mulf %251, %250 : vector<16x128xf32>
      %253 = arith.addf %248, %252 : vector<16x128xf32>
      %c40 = arith.constant 40 : index
      %254 = memref.load %arg3[%c40] : memref<98xf32, #tpu.memory_space<smem>>
      %c126_i32_92 = arith.constant 126 : i32
      %255 = tpu.dynamic_rotate %229 by %c126_i32_92 dim 1 : vector<16x128xf32>, i32 -> vector<16x128xf32>
      %256 = vector.broadcast %254 : f32 to vector<16x128xf32>
      %257 = arith.mulf %256, %255 : vector<16x128xf32>
      %258 = arith.addf %253, %257 : vector<16x128xf32>
      %c41 = arith.constant 41 : index
      %259 = memref.load %arg3[%c41] : memref<98xf32, #tpu.memory_space<smem>>
      %c125_i32_93 = arith.constant 125 : i32
      %260 = tpu.dynamic_rotate %229 by %c125_i32_93 dim 1 : vector<16x128xf32>, i32 -> vector<16x128xf32>
      %261 = vector.broadcast %259 : f32 to vector<16x128xf32>
      %262 = arith.mulf %261, %260 : vector<16x128xf32>
      %263 = arith.addf %258, %262 : vector<16x128xf32>
      %c0_94 = arith.constant 0 : index
      %c6_95 = arith.constant 6 : index
      %c0_96 = arith.constant 0 : index
      %264 = vector.load %arg7[%c0_94, %c6_95, %c0_96] : memref<2x22x128xf32, #tpu.memory_space<vmem>>, vector<1x16x128xf32>
      %265 = vector.shape_cast %264 : vector<1x16x128xf32> to vector<16x128xf32>
      %c42 = arith.constant 42 : index
      %266 = memref.load %arg3[%c42] : memref<98xf32, #tpu.memory_space<smem>>
      %c3_i32_97 = arith.constant 3 : i32
      %267 = tpu.dynamic_rotate %265 by %c3_i32_97 dim 1 : vector<16x128xf32>, i32 -> vector<16x128xf32>
      %268 = vector.broadcast %266 : f32 to vector<16x128xf32>
      %269 = arith.mulf %268, %267 : vector<16x128xf32>
      %270 = arith.addf %263, %269 : vector<16x128xf32>
      %c43 = arith.constant 43 : index
      %271 = memref.load %arg3[%c43] : memref<98xf32, #tpu.memory_space<smem>>
      %c2_i32_98 = arith.constant 2 : i32
      %272 = tpu.dynamic_rotate %265 by %c2_i32_98 dim 1 : vector<16x128xf32>, i32 -> vector<16x128xf32>
      %273 = vector.broadcast %271 : f32 to vector<16x128xf32>
      %274 = arith.mulf %273, %272 : vector<16x128xf32>
      %275 = arith.addf %270, %274 : vector<16x128xf32>
      %c44 = arith.constant 44 : index
      %276 = memref.load %arg3[%c44] : memref<98xf32, #tpu.memory_space<smem>>
      %c1_i32_99 = arith.constant 1 : i32
      %277 = tpu.dynamic_rotate %265 by %c1_i32_99 dim 1 : vector<16x128xf32>, i32 -> vector<16x128xf32>
      %278 = vector.broadcast %276 : f32 to vector<16x128xf32>
      %279 = arith.mulf %278, %277 : vector<16x128xf32>
      %280 = arith.addf %275, %279 : vector<16x128xf32>
      %c45 = arith.constant 45 : index
      %281 = memref.load %arg3[%c45] : memref<98xf32, #tpu.memory_space<smem>>
      %282 = vector.broadcast %281 : f32 to vector<16x128xf32>
      %283 = arith.mulf %282, %265 : vector<16x128xf32>
      %284 = arith.addf %280, %283 : vector<16x128xf32>
      %c46 = arith.constant 46 : index
      %285 = memref.load %arg3[%c46] : memref<98xf32, #tpu.memory_space<smem>>
      %c127_i32_100 = arith.constant 127 : i32
      %286 = tpu.dynamic_rotate %265 by %c127_i32_100 dim 1 : vector<16x128xf32>, i32 -> vector<16x128xf32>
      %287 = vector.broadcast %285 : f32 to vector<16x128xf32>
      %288 = arith.mulf %287, %286 : vector<16x128xf32>
      %289 = arith.addf %284, %288 : vector<16x128xf32>
      %c47 = arith.constant 47 : index
      %290 = memref.load %arg3[%c47] : memref<98xf32, #tpu.memory_space<smem>>
      %c126_i32_101 = arith.constant 126 : i32
      %291 = tpu.dynamic_rotate %265 by %c126_i32_101 dim 1 : vector<16x128xf32>, i32 -> vector<16x128xf32>
      %292 = vector.broadcast %290 : f32 to vector<16x128xf32>
      %293 = arith.mulf %292, %291 : vector<16x128xf32>
      %294 = arith.addf %289, %293 : vector<16x128xf32>
      %c48 = arith.constant 48 : index
      %295 = memref.load %arg3[%c48] : memref<98xf32, #tpu.memory_space<smem>>
      %c125_i32_102 = arith.constant 125 : i32
      %296 = tpu.dynamic_rotate %265 by %c125_i32_102 dim 1 : vector<16x128xf32>, i32 -> vector<16x128xf32>
      %297 = vector.broadcast %295 : f32 to vector<16x128xf32>
      %298 = arith.mulf %297, %296 : vector<16x128xf32>
      %299 = arith.addf %294, %298 : vector<16x128xf32>
      %c1_103 = arith.constant 1 : index
      %c0_104 = arith.constant 0 : index
      %c0_105 = arith.constant 0 : index
      %300 = vector.load %arg7[%c1_103, %c0_104, %c0_105] : memref<2x22x128xf32, #tpu.memory_space<vmem>>, vector<1x16x128xf32>
      %301 = vector.shape_cast %300 : vector<1x16x128xf32> to vector<16x128xf32>
      %c49 = arith.constant 49 : index
      %302 = memref.load %arg3[%c49] : memref<98xf32, #tpu.memory_space<smem>>
      %c3_i32_106 = arith.constant 3 : i32
      %303 = tpu.dynamic_rotate %301 by %c3_i32_106 dim 1 : vector<16x128xf32>, i32 -> vector<16x128xf32>
      %304 = vector.broadcast %302 : f32 to vector<16x128xf32>
      %305 = arith.mulf %304, %303 : vector<16x128xf32>
      %306 = arith.addf %299, %305 : vector<16x128xf32>
      %c50 = arith.constant 50 : index
      %307 = memref.load %arg3[%c50] : memref<98xf32, #tpu.memory_space<smem>>
      %c2_i32_107 = arith.constant 2 : i32
      %308 = tpu.dynamic_rotate %301 by %c2_i32_107 dim 1 : vector<16x128xf32>, i32 -> vector<16x128xf32>
      %309 = vector.broadcast %307 : f32 to vector<16x128xf32>
      %310 = arith.mulf %309, %308 : vector<16x128xf32>
      %311 = arith.addf %306, %310 : vector<16x128xf32>
      %c51 = arith.constant 51 : index
      %312 = memref.load %arg3[%c51] : memref<98xf32, #tpu.memory_space<smem>>
      %c1_i32_108 = arith.constant 1 : i32
      %313 = tpu.dynamic_rotate %301 by %c1_i32_108 dim 1 : vector<16x128xf32>, i32 -> vector<16x128xf32>
      %314 = vector.broadcast %312 : f32 to vector<16x128xf32>
      %315 = arith.mulf %314, %313 : vector<16x128xf32>
      %316 = arith.addf %311, %315 : vector<16x128xf32>
      %c52 = arith.constant 52 : index
      %317 = memref.load %arg3[%c52] : memref<98xf32, #tpu.memory_space<smem>>
      %318 = vector.broadcast %317 : f32 to vector<16x128xf32>
      %319 = arith.mulf %318, %301 : vector<16x128xf32>
      %320 = arith.addf %316, %319 : vector<16x128xf32>
      %c53 = arith.constant 53 : index
      %321 = memref.load %arg3[%c53] : memref<98xf32, #tpu.memory_space<smem>>
      %c127_i32_109 = arith.constant 127 : i32
      %322 = tpu.dynamic_rotate %301 by %c127_i32_109 dim 1 : vector<16x128xf32>, i32 -> vector<16x128xf32>
      %323 = vector.broadcast %321 : f32 to vector<16x128xf32>
      %324 = arith.mulf %323, %322 : vector<16x128xf32>
      %325 = arith.addf %320, %324 : vector<16x128xf32>
      %c54 = arith.constant 54 : index
      %326 = memref.load %arg3[%c54] : memref<98xf32, #tpu.memory_space<smem>>
      %c126_i32_110 = arith.constant 126 : i32
      %327 = tpu.dynamic_rotate %301 by %c126_i32_110 dim 1 : vector<16x128xf32>, i32 -> vector<16x128xf32>
      %328 = vector.broadcast %326 : f32 to vector<16x128xf32>
      %329 = arith.mulf %328, %327 : vector<16x128xf32>
      %330 = arith.addf %325, %329 : vector<16x128xf32>
      %c55 = arith.constant 55 : index
      %331 = memref.load %arg3[%c55] : memref<98xf32, #tpu.memory_space<smem>>
      %c125_i32_111 = arith.constant 125 : i32
      %332 = tpu.dynamic_rotate %301 by %c125_i32_111 dim 1 : vector<16x128xf32>, i32 -> vector<16x128xf32>
      %333 = vector.broadcast %331 : f32 to vector<16x128xf32>
      %334 = arith.mulf %333, %332 : vector<16x128xf32>
      %335 = arith.addf %330, %334 : vector<16x128xf32>
      %c1_112 = arith.constant 1 : index
      %c1_113 = arith.constant 1 : index
      %c0_114 = arith.constant 0 : index
      %336 = vector.load %arg7[%c1_112, %c1_113, %c0_114] : memref<2x22x128xf32, #tpu.memory_space<vmem>>, vector<1x16x128xf32>
      %337 = vector.shape_cast %336 : vector<1x16x128xf32> to vector<16x128xf32>
      %c56 = arith.constant 56 : index
      %338 = memref.load %arg3[%c56] : memref<98xf32, #tpu.memory_space<smem>>
      %c3_i32_115 = arith.constant 3 : i32
      %339 = tpu.dynamic_rotate %337 by %c3_i32_115 dim 1 : vector<16x128xf32>, i32 -> vector<16x128xf32>
      %340 = vector.broadcast %338 : f32 to vector<16x128xf32>
      %341 = arith.mulf %340, %339 : vector<16x128xf32>
      %342 = arith.addf %335, %341 : vector<16x128xf32>
      %c57 = arith.constant 57 : index
      %343 = memref.load %arg3[%c57] : memref<98xf32, #tpu.memory_space<smem>>
      %c2_i32_116 = arith.constant 2 : i32
      %344 = tpu.dynamic_rotate %337 by %c2_i32_116 dim 1 : vector<16x128xf32>, i32 -> vector<16x128xf32>
      %345 = vector.broadcast %343 : f32 to vector<16x128xf32>
      %346 = arith.mulf %345, %344 : vector<16x128xf32>
      %347 = arith.addf %342, %346 : vector<16x128xf32>
      %c58 = arith.constant 58 : index
      %348 = memref.load %arg3[%c58] : memref<98xf32, #tpu.memory_space<smem>>
      %c1_i32_117 = arith.constant 1 : i32
      %349 = tpu.dynamic_rotate %337 by %c1_i32_117 dim 1 : vector<16x128xf32>, i32 -> vector<16x128xf32>
      %350 = vector.broadcast %348 : f32 to vector<16x128xf32>
      %351 = arith.mulf %350, %349 : vector<16x128xf32>
      %352 = arith.addf %347, %351 : vector<16x128xf32>
      %c59 = arith.constant 59 : index
      %353 = memref.load %arg3[%c59] : memref<98xf32, #tpu.memory_space<smem>>
      %354 = vector.broadcast %353 : f32 to vector<16x128xf32>
      %355 = arith.mulf %354, %337 : vector<16x128xf32>
      %356 = arith.addf %352, %355 : vector<16x128xf32>
      %c60 = arith.constant 60 : index
      %357 = memref.load %arg3[%c60] : memref<98xf32, #tpu.memory_space<smem>>
      %c127_i32_118 = arith.constant 127 : i32
      %358 = tpu.dynamic_rotate %337 by %c127_i32_118 dim 1 : vector<16x128xf32>, i32 -> vector<16x128xf32>
      %359 = vector.broadcast %357 : f32 to vector<16x128xf32>
      %360 = arith.mulf %359, %358 : vector<16x128xf32>
      %361 = arith.addf %356, %360 : vector<16x128xf32>
      %c61 = arith.constant 61 : index
      %362 = memref.load %arg3[%c61] : memref<98xf32, #tpu.memory_space<smem>>
      %c126_i32_119 = arith.constant 126 : i32
      %363 = tpu.dynamic_rotate %337 by %c126_i32_119 dim 1 : vector<16x128xf32>, i32 -> vector<16x128xf32>
      %364 = vector.broadcast %362 : f32 to vector<16x128xf32>
      %365 = arith.mulf %364, %363 : vector<16x128xf32>
      %366 = arith.addf %361, %365 : vector<16x128xf32>
      %c62 = arith.constant 62 : index
      %367 = memref.load %arg3[%c62] : memref<98xf32, #tpu.memory_space<smem>>
      %c125_i32_120 = arith.constant 125 : i32
      %368 = tpu.dynamic_rotate %337 by %c125_i32_120 dim 1 : vector<16x128xf32>, i32 -> vector<16x128xf32>
      %369 = vector.broadcast %367 : f32 to vector<16x128xf32>
      %370 = arith.mulf %369, %368 : vector<16x128xf32>
      %371 = arith.addf %366, %370 : vector<16x128xf32>
      %c1_121 = arith.constant 1 : index
      %c2_122 = arith.constant 2 : index
      %c0_123 = arith.constant 0 : index
      %372 = vector.load %arg7[%c1_121, %c2_122, %c0_123] : memref<2x22x128xf32, #tpu.memory_space<vmem>>, vector<1x16x128xf32>
      %373 = vector.shape_cast %372 : vector<1x16x128xf32> to vector<16x128xf32>
      %c63 = arith.constant 63 : index
      %374 = memref.load %arg3[%c63] : memref<98xf32, #tpu.memory_space<smem>>
      %c3_i32_124 = arith.constant 3 : i32
      %375 = tpu.dynamic_rotate %373 by %c3_i32_124 dim 1 : vector<16x128xf32>, i32 -> vector<16x128xf32>
      %376 = vector.broadcast %374 : f32 to vector<16x128xf32>
      %377 = arith.mulf %376, %375 : vector<16x128xf32>
      %378 = arith.addf %371, %377 : vector<16x128xf32>
      %c64 = arith.constant 64 : index
      %379 = memref.load %arg3[%c64] : memref<98xf32, #tpu.memory_space<smem>>
      %c2_i32_125 = arith.constant 2 : i32
      %380 = tpu.dynamic_rotate %373 by %c2_i32_125 dim 1 : vector<16x128xf32>, i32 -> vector<16x128xf32>
      %381 = vector.broadcast %379 : f32 to vector<16x128xf32>
      %382 = arith.mulf %381, %380 : vector<16x128xf32>
      %383 = arith.addf %378, %382 : vector<16x128xf32>
      %c65 = arith.constant 65 : index
      %384 = memref.load %arg3[%c65] : memref<98xf32, #tpu.memory_space<smem>>
      %c1_i32_126 = arith.constant 1 : i32
      %385 = tpu.dynamic_rotate %373 by %c1_i32_126 dim 1 : vector<16x128xf32>, i32 -> vector<16x128xf32>
      %386 = vector.broadcast %384 : f32 to vector<16x128xf32>
      %387 = arith.mulf %386, %385 : vector<16x128xf32>
      %388 = arith.addf %383, %387 : vector<16x128xf32>
      %c66 = arith.constant 66 : index
      %389 = memref.load %arg3[%c66] : memref<98xf32, #tpu.memory_space<smem>>
      %390 = vector.broadcast %389 : f32 to vector<16x128xf32>
      %391 = arith.mulf %390, %373 : vector<16x128xf32>
      %392 = arith.addf %388, %391 : vector<16x128xf32>
      %c67 = arith.constant 67 : index
      %393 = memref.load %arg3[%c67] : memref<98xf32, #tpu.memory_space<smem>>
      %c127_i32_127 = arith.constant 127 : i32
      %394 = tpu.dynamic_rotate %373 by %c127_i32_127 dim 1 : vector<16x128xf32>, i32 -> vector<16x128xf32>
      %395 = vector.broadcast %393 : f32 to vector<16x128xf32>
      %396 = arith.mulf %395, %394 : vector<16x128xf32>
      %397 = arith.addf %392, %396 : vector<16x128xf32>
      %c68 = arith.constant 68 : index
      %398 = memref.load %arg3[%c68] : memref<98xf32, #tpu.memory_space<smem>>
      %c126_i32_128 = arith.constant 126 : i32
      %399 = tpu.dynamic_rotate %373 by %c126_i32_128 dim 1 : vector<16x128xf32>, i32 -> vector<16x128xf32>
      %400 = vector.broadcast %398 : f32 to vector<16x128xf32>
      %401 = arith.mulf %400, %399 : vector<16x128xf32>
      %402 = arith.addf %397, %401 : vector<16x128xf32>
      %c69 = arith.constant 69 : index
      %403 = memref.load %arg3[%c69] : memref<98xf32, #tpu.memory_space<smem>>
      %c125_i32_129 = arith.constant 125 : i32
      %404 = tpu.dynamic_rotate %373 by %c125_i32_129 dim 1 : vector<16x128xf32>, i32 -> vector<16x128xf32>
      %405 = vector.broadcast %403 : f32 to vector<16x128xf32>
      %406 = arith.mulf %405, %404 : vector<16x128xf32>
      %407 = arith.addf %402, %406 : vector<16x128xf32>
      %c1_130 = arith.constant 1 : index
      %c3_131 = arith.constant 3 : index
      %c0_132 = arith.constant 0 : index
      %408 = vector.load %arg7[%c1_130, %c3_131, %c0_132] : memref<2x22x128xf32, #tpu.memory_space<vmem>>, vector<1x16x128xf32>
      %409 = vector.shape_cast %408 : vector<1x16x128xf32> to vector<16x128xf32>
      %c70 = arith.constant 70 : index
      %410 = memref.load %arg3[%c70] : memref<98xf32, #tpu.memory_space<smem>>
      %c3_i32_133 = arith.constant 3 : i32
      %411 = tpu.dynamic_rotate %409 by %c3_i32_133 dim 1 : vector<16x128xf32>, i32 -> vector<16x128xf32>
      %412 = vector.broadcast %410 : f32 to vector<16x128xf32>
      %413 = arith.mulf %412, %411 : vector<16x128xf32>
      %414 = arith.addf %407, %413 : vector<16x128xf32>
      %c71 = arith.constant 71 : index
      %415 = memref.load %arg3[%c71] : memref<98xf32, #tpu.memory_space<smem>>
      %c2_i32_134 = arith.constant 2 : i32
      %416 = tpu.dynamic_rotate %409 by %c2_i32_134 dim 1 : vector<16x128xf32>, i32 -> vector<16x128xf32>
      %417 = vector.broadcast %415 : f32 to vector<16x128xf32>
      %418 = arith.mulf %417, %416 : vector<16x128xf32>
      %419 = arith.addf %414, %418 : vector<16x128xf32>
      %c72 = arith.constant 72 : index
      %420 = memref.load %arg3[%c72] : memref<98xf32, #tpu.memory_space<smem>>
      %c1_i32_135 = arith.constant 1 : i32
      %421 = tpu.dynamic_rotate %409 by %c1_i32_135 dim 1 : vector<16x128xf32>, i32 -> vector<16x128xf32>
      %422 = vector.broadcast %420 : f32 to vector<16x128xf32>
      %423 = arith.mulf %422, %421 : vector<16x128xf32>
      %424 = arith.addf %419, %423 : vector<16x128xf32>
      %c73 = arith.constant 73 : index
      %425 = memref.load %arg3[%c73] : memref<98xf32, #tpu.memory_space<smem>>
      %426 = vector.broadcast %425 : f32 to vector<16x128xf32>
      %427 = arith.mulf %426, %409 : vector<16x128xf32>
      %428 = arith.addf %424, %427 : vector<16x128xf32>
      %c74 = arith.constant 74 : index
      %429 = memref.load %arg3[%c74] : memref<98xf32, #tpu.memory_space<smem>>
      %c127_i32_136 = arith.constant 127 : i32
      %430 = tpu.dynamic_rotate %409 by %c127_i32_136 dim 1 : vector<16x128xf32>, i32 -> vector<16x128xf32>
      %431 = vector.broadcast %429 : f32 to vector<16x128xf32>
      %432 = arith.mulf %431, %430 : vector<16x128xf32>
      %433 = arith.addf %428, %432 : vector<16x128xf32>
      %c75 = arith.constant 75 : index
      %434 = memref.load %arg3[%c75] : memref<98xf32, #tpu.memory_space<smem>>
      %c126_i32_137 = arith.constant 126 : i32
      %435 = tpu.dynamic_rotate %409 by %c126_i32_137 dim 1 : vector<16x128xf32>, i32 -> vector<16x128xf32>
      %436 = vector.broadcast %434 : f32 to vector<16x128xf32>
      %437 = arith.mulf %436, %435 : vector<16x128xf32>
      %438 = arith.addf %433, %437 : vector<16x128xf32>
      %c76 = arith.constant 76 : index
      %439 = memref.load %arg3[%c76] : memref<98xf32, #tpu.memory_space<smem>>
      %c125_i32_138 = arith.constant 125 : i32
      %440 = tpu.dynamic_rotate %409 by %c125_i32_138 dim 1 : vector<16x128xf32>, i32 -> vector<16x128xf32>
      %441 = vector.broadcast %439 : f32 to vector<16x128xf32>
      %442 = arith.mulf %441, %440 : vector<16x128xf32>
      %443 = arith.addf %438, %442 : vector<16x128xf32>
      %c1_139 = arith.constant 1 : index
      %c4_140 = arith.constant 4 : index
      %c0_141 = arith.constant 0 : index
      %444 = vector.load %arg7[%c1_139, %c4_140, %c0_141] : memref<2x22x128xf32, #tpu.memory_space<vmem>>, vector<1x16x128xf32>
      %445 = vector.shape_cast %444 : vector<1x16x128xf32> to vector<16x128xf32>
      %c77 = arith.constant 77 : index
      %446 = memref.load %arg3[%c77] : memref<98xf32, #tpu.memory_space<smem>>
      %c3_i32_142 = arith.constant 3 : i32
      %447 = tpu.dynamic_rotate %445 by %c3_i32_142 dim 1 : vector<16x128xf32>, i32 -> vector<16x128xf32>
      %448 = vector.broadcast %446 : f32 to vector<16x128xf32>
      %449 = arith.mulf %448, %447 : vector<16x128xf32>
      %450 = arith.addf %443, %449 : vector<16x128xf32>
      %c78 = arith.constant 78 : index
      %451 = memref.load %arg3[%c78] : memref<98xf32, #tpu.memory_space<smem>>
      %c2_i32_143 = arith.constant 2 : i32
      %452 = tpu.dynamic_rotate %445 by %c2_i32_143 dim 1 : vector<16x128xf32>, i32 -> vector<16x128xf32>
      %453 = vector.broadcast %451 : f32 to vector<16x128xf32>
      %454 = arith.mulf %453, %452 : vector<16x128xf32>
      %455 = arith.addf %450, %454 : vector<16x128xf32>
      %c79 = arith.constant 79 : index
      %456 = memref.load %arg3[%c79] : memref<98xf32, #tpu.memory_space<smem>>
      %c1_i32_144 = arith.constant 1 : i32
      %457 = tpu.dynamic_rotate %445 by %c1_i32_144 dim 1 : vector<16x128xf32>, i32 -> vector<16x128xf32>
      %458 = vector.broadcast %456 : f32 to vector<16x128xf32>
      %459 = arith.mulf %458, %457 : vector<16x128xf32>
      %460 = arith.addf %455, %459 : vector<16x128xf32>
      %c80 = arith.constant 80 : index
      %461 = memref.load %arg3[%c80] : memref<98xf32, #tpu.memory_space<smem>>
      %462 = vector.broadcast %461 : f32 to vector<16x128xf32>
      %463 = arith.mulf %462, %445 : vector<16x128xf32>
      %464 = arith.addf %460, %463 : vector<16x128xf32>
      %c81 = arith.constant 81 : index
      %465 = memref.load %arg3[%c81] : memref<98xf32, #tpu.memory_space<smem>>
      %c127_i32_145 = arith.constant 127 : i32
      %466 = tpu.dynamic_rotate %445 by %c127_i32_145 dim 1 : vector<16x128xf32>, i32 -> vector<16x128xf32>
      %467 = vector.broadcast %465 : f32 to vector<16x128xf32>
      %468 = arith.mulf %467, %466 : vector<16x128xf32>
      %469 = arith.addf %464, %468 : vector<16x128xf32>
      %c82 = arith.constant 82 : index
      %470 = memref.load %arg3[%c82] : memref<98xf32, #tpu.memory_space<smem>>
      %c126_i32_146 = arith.constant 126 : i32
      %471 = tpu.dynamic_rotate %445 by %c126_i32_146 dim 1 : vector<16x128xf32>, i32 -> vector<16x128xf32>
      %472 = vector.broadcast %470 : f32 to vector<16x128xf32>
      %473 = arith.mulf %472, %471 : vector<16x128xf32>
      %474 = arith.addf %469, %473 : vector<16x128xf32>
      %c83 = arith.constant 83 : index
      %475 = memref.load %arg3[%c83] : memref<98xf32, #tpu.memory_space<smem>>
      %c125_i32_147 = arith.constant 125 : i32
      %476 = tpu.dynamic_rotate %445 by %c125_i32_147 dim 1 : vector<16x128xf32>, i32 -> vector<16x128xf32>
      %477 = vector.broadcast %475 : f32 to vector<16x128xf32>
      %478 = arith.mulf %477, %476 : vector<16x128xf32>
      %479 = arith.addf %474, %478 : vector<16x128xf32>
      %c1_148 = arith.constant 1 : index
      %c5_149 = arith.constant 5 : index
      %c0_150 = arith.constant 0 : index
      %480 = vector.load %arg7[%c1_148, %c5_149, %c0_150] : memref<2x22x128xf32, #tpu.memory_space<vmem>>, vector<1x16x128xf32>
      %481 = vector.shape_cast %480 : vector<1x16x128xf32> to vector<16x128xf32>
      %c84 = arith.constant 84 : index
      %482 = memref.load %arg3[%c84] : memref<98xf32, #tpu.memory_space<smem>>
      %c3_i32_151 = arith.constant 3 : i32
      %483 = tpu.dynamic_rotate %481 by %c3_i32_151 dim 1 : vector<16x128xf32>, i32 -> vector<16x128xf32>
      %484 = vector.broadcast %482 : f32 to vector<16x128xf32>
      %485 = arith.mulf %484, %483 : vector<16x128xf32>
      %486 = arith.addf %479, %485 : vector<16x128xf32>
      %c85 = arith.constant 85 : index
      %487 = memref.load %arg3[%c85] : memref<98xf32, #tpu.memory_space<smem>>
      %c2_i32_152 = arith.constant 2 : i32
      %488 = tpu.dynamic_rotate %481 by %c2_i32_152 dim 1 : vector<16x128xf32>, i32 -> vector<16x128xf32>
      %489 = vector.broadcast %487 : f32 to vector<16x128xf32>
      %490 = arith.mulf %489, %488 : vector<16x128xf32>
      %491 = arith.addf %486, %490 : vector<16x128xf32>
      %c86 = arith.constant 86 : index
      %492 = memref.load %arg3[%c86] : memref<98xf32, #tpu.memory_space<smem>>
      %c1_i32_153 = arith.constant 1 : i32
      %493 = tpu.dynamic_rotate %481 by %c1_i32_153 dim 1 : vector<16x128xf32>, i32 -> vector<16x128xf32>
      %494 = vector.broadcast %492 : f32 to vector<16x128xf32>
      %495 = arith.mulf %494, %493 : vector<16x128xf32>
      %496 = arith.addf %491, %495 : vector<16x128xf32>
      %c87 = arith.constant 87 : index
      %497 = memref.load %arg3[%c87] : memref<98xf32, #tpu.memory_space<smem>>
      %498 = vector.broadcast %497 : f32 to vector<16x128xf32>
      %499 = arith.mulf %498, %481 : vector<16x128xf32>
      %500 = arith.addf %496, %499 : vector<16x128xf32>
      %c88 = arith.constant 88 : index
      %501 = memref.load %arg3[%c88] : memref<98xf32, #tpu.memory_space<smem>>
      %c127_i32_154 = arith.constant 127 : i32
      %502 = tpu.dynamic_rotate %481 by %c127_i32_154 dim 1 : vector<16x128xf32>, i32 -> vector<16x128xf32>
      %503 = vector.broadcast %501 : f32 to vector<16x128xf32>
      %504 = arith.mulf %503, %502 : vector<16x128xf32>
      %505 = arith.addf %500, %504 : vector<16x128xf32>
      %c89 = arith.constant 89 : index
      %506 = memref.load %arg3[%c89] : memref<98xf32, #tpu.memory_space<smem>>
      %c126_i32_155 = arith.constant 126 : i32
      %507 = tpu.dynamic_rotate %481 by %c126_i32_155 dim 1 : vector<16x128xf32>, i32 -> vector<16x128xf32>
      %508 = vector.broadcast %506 : f32 to vector<16x128xf32>
      %509 = arith.mulf %508, %507 : vector<16x128xf32>
      %510 = arith.addf %505, %509 : vector<16x128xf32>
      %c90 = arith.constant 90 : index
      %511 = memref.load %arg3[%c90] : memref<98xf32, #tpu.memory_space<smem>>
      %c125_i32_156 = arith.constant 125 : i32
      %512 = tpu.dynamic_rotate %481 by %c125_i32_156 dim 1 : vector<16x128xf32>, i32 -> vector<16x128xf32>
      %513 = vector.broadcast %511 : f32 to vector<16x128xf32>
      %514 = arith.mulf %513, %512 : vector<16x128xf32>
      %515 = arith.addf %510, %514 : vector<16x128xf32>
      %c1_157 = arith.constant 1 : index
      %c6_158 = arith.constant 6 : index
      %c0_159 = arith.constant 0 : index
      %516 = vector.load %arg7[%c1_157, %c6_158, %c0_159] : memref<2x22x128xf32, #tpu.memory_space<vmem>>, vector<1x16x128xf32>
      %517 = vector.shape_cast %516 : vector<1x16x128xf32> to vector<16x128xf32>
      %c91 = arith.constant 91 : index
      %518 = memref.load %arg3[%c91] : memref<98xf32, #tpu.memory_space<smem>>
      %c3_i32_160 = arith.constant 3 : i32
      %519 = tpu.dynamic_rotate %517 by %c3_i32_160 dim 1 : vector<16x128xf32>, i32 -> vector<16x128xf32>
      %520 = vector.broadcast %518 : f32 to vector<16x128xf32>
      %521 = arith.mulf %520, %519 : vector<16x128xf32>
      %522 = arith.addf %515, %521 : vector<16x128xf32>
      %c92 = arith.constant 92 : index
      %523 = memref.load %arg3[%c92] : memref<98xf32, #tpu.memory_space<smem>>
      %c2_i32_161 = arith.constant 2 : i32
      %524 = tpu.dynamic_rotate %517 by %c2_i32_161 dim 1 : vector<16x128xf32>, i32 -> vector<16x128xf32>
      %525 = vector.broadcast %523 : f32 to vector<16x128xf32>
      %526 = arith.mulf %525, %524 : vector<16x128xf32>
      %527 = arith.addf %522, %526 : vector<16x128xf32>
      %c93 = arith.constant 93 : index
      %528 = memref.load %arg3[%c93] : memref<98xf32, #tpu.memory_space<smem>>
      %c1_i32_162 = arith.constant 1 : i32
      %529 = tpu.dynamic_rotate %517 by %c1_i32_162 dim 1 : vector<16x128xf32>, i32 -> vector<16x128xf32>
      %530 = vector.broadcast %528 : f32 to vector<16x128xf32>
      %531 = arith.mulf %530, %529 : vector<16x128xf32>
      %532 = arith.addf %527, %531 : vector<16x128xf32>
      %c94 = arith.constant 94 : index
      %533 = memref.load %arg3[%c94] : memref<98xf32, #tpu.memory_space<smem>>
      %534 = vector.broadcast %533 : f32 to vector<16x128xf32>
      %535 = arith.mulf %534, %517 : vector<16x128xf32>
      %536 = arith.addf %532, %535 : vector<16x128xf32>
      %c95 = arith.constant 95 : index
      %537 = memref.load %arg3[%c95] : memref<98xf32, #tpu.memory_space<smem>>
      %c127_i32_163 = arith.constant 127 : i32
      %538 = tpu.dynamic_rotate %517 by %c127_i32_163 dim 1 : vector<16x128xf32>, i32 -> vector<16x128xf32>
      %539 = vector.broadcast %537 : f32 to vector<16x128xf32>
      %540 = arith.mulf %539, %538 : vector<16x128xf32>
      %541 = arith.addf %536, %540 : vector<16x128xf32>
      %c96 = arith.constant 96 : index
      %542 = memref.load %arg3[%c96] : memref<98xf32, #tpu.memory_space<smem>>
      %c126_i32_164 = arith.constant 126 : i32
      %543 = tpu.dynamic_rotate %517 by %c126_i32_164 dim 1 : vector<16x128xf32>, i32 -> vector<16x128xf32>
      %544 = vector.broadcast %542 : f32 to vector<16x128xf32>
      %545 = arith.mulf %544, %543 : vector<16x128xf32>
      %546 = arith.addf %541, %545 : vector<16x128xf32>
      %c97 = arith.constant 97 : index
      %547 = memref.load %arg3[%c97] : memref<98xf32, #tpu.memory_space<smem>>
      %c125_i32_165 = arith.constant 125 : i32
      %548 = tpu.dynamic_rotate %517 by %c125_i32_165 dim 1 : vector<16x128xf32>, i32 -> vector<16x128xf32>
      %549 = vector.broadcast %547 : f32 to vector<16x128xf32>
      %550 = arith.mulf %549, %548 : vector<16x128xf32>
      %551 = arith.addf %546, %550 : vector<16x128xf32>
      %552 = vector.extract_strided_slice %551 {offsets = [0, 0], sizes = [16, 32], strides = [1, 1]} : vector<16x128xf32> to vector<16x32xf32>
      %553 = arith.negf %552 : vector<16x32xf32>
      %554 = math.exp %553 : vector<16x32xf32>
      %cst_166 = arith.constant 1.000000e+00 : f32
      %555 = vector.broadcast %cst_166 : f32 to vector<16x32xf32>
      %556 = arith.addf %555, %554 : vector<16x32xf32>
      %557 = arith.divf %555, %556 : vector<16x32xf32>
      %c0_167 = arith.constant 0 : index
      %c0_168 = arith.constant 0 : index
      %c0_169 = arith.constant 0 : index
      %c0_170 = arith.constant 0 : index
      %558 = vector.load %arg4[%c0_167, %c0_168, %c0_169, %c0_170] : memref<1x1x16x32xf32, #tpu.memory_space<vmem>>, vector<1x1x16x32xf32>
      %559 = vector.shape_cast %558 : vector<1x1x16x32xf32> to vector<16x32xf32>
      %560 = vector.shape_cast %557 : vector<16x32xf32> to vector<1x1x16x32xf32>
      tpu.vector_store %arg4[%c0_167, %c0_168, %c0_169, %c0_170], %560 {strides = array<i32>} : memref<1x1x16x32xf32, #tpu.memory_space<vmem>>, vector<1x1x16x32xf32>,
    } else {
    }
    return
  }
  func.func @transform_0(%arg0: i32, %arg1: i32) -> (i32, i32, i32, i32) {
    %c0_i32 = arith.constant 0 : i32
    %c0_i32_0 = arith.constant 0 : i32
    %c0_i32_1 = arith.constant 0 : i32
    return %arg0, %arg1, %c0_i32, %c0_i32_0 : i32, i32, i32, i32
  }
  func.func @transform_1(%arg0: i32, %arg1: i32) -> i32 {
    %c0_i32 = arith.constant 0 : i32
    %c0_i32_0 = arith.constant 0 : i32
    return %c0_i32 : i32
  }
  func.func @transform_2(%arg0: i32, %arg1: i32) -> (i32, i32, i32, i32) {
    %c0_i32 = arith.constant 0 : i32
    %c0_i32_0 = arith.constant 0 : i32
    %c0_i32_1 = arith.constant 0 : i32
    %c0_i32_2 = arith.constant 0 : i32
    return %arg0, %c0_i32, %c0_i32_0, %c0_i32_1 : i32, i32, i32, i32
  }
}

</mosaic_0001>

<bundles_post_ra>
// kernel: spatial_attention.1
= control target key start
LH: loop header
LB: loop body
LE: loop exit
PB: predicated region body
PF: predicated region fallthrough
CT: control target
= control target key end

     0   :  { %s2613_s0 = inlined_call_operand.hbm [shape: f32[2,8,16,32], index: 0, kind: input, shape index: {}]   ;;  %s2614_s1 = inlined_call_operand.vmem [shape: f32[98], index: 1, kind: input, shape index: {}]   ;;  %s2615_s2 = inlined_call_operand.hbm [shape: f32[2,1,16,32], index: 2, kind: output, shape index: {}]  }
   0x1   :  { %2623 = sst [smem:[#allocation18_spill]] %s2614_s1 }
   0x2   :  { %7 = vsyncpa [#allocation6], 0 }
   0x3   :  { %9 = vsyncpa [#allocation6 + $0x1], 0 }
   0x4   :  { %10 = vsyncpa [#allocation8], 0 }
   0x5   :  { %11 = vsyncpa [#allocation7], 0 }
   0x6   :  { %13 = vsyncpa [#allocation7 + $0x1], 0  ;;  %s1795_s9 = smov 0   ;;  %s1797_s10 = smov 0  }
   0x7   :  { %s1799_s11 = smov 0   ;;  %s1801_s12 = smov 0  }
   0x8   :  { %s1803_s13 = smov 0   ;;  %s1805_s14 = smov 0  }
   0x9   :  { %s1807_s15 = smov 0   ;;  %s1809_s16 = smov 0  }
   0xa   :  { %s1811_s17 = smov 0   ;;  %s1813_s18 = smov 0  }
   0xb   :  { %s1815_s19 = smov 0  }
   0xc LB: > { %2624 = sst [smem:[#allocation14_spill]] %s1756_s17  ;;  %s1338_s20 = sadd.s32 4294967295, %s1764_s19   ;;  %s1764_s19 = sphi %s1815_s19, %s19_s19   ;;  %s1760_s18 = sphi %s1813_s18, %s2653_s18   ;;  %s1756_s17 = sphi %s1811_s17, %s2644_s17   ;;  %s1752_s16 = sphi %s1809_s16, %s2652_s16   ;;  %s1748_s15 = sphi %s1807_s15, %s2643_s15   ;;  %s1744_s14 = sphi %s1805_s14, %s2651_s14   ;;  %s1740_s13 = sphi %s1803_s13, %s2650_s13   ;;  %s1736_s12 = sphi %s1801_s12, %s2649_s12   ;;  %s1732_s11 = sphi %s1799_s11, %s2648_s11   ;;  %s1728_s10 = sphi %s1797_s10, %s2647_s10   ;;  %s1724_s9 = sphi %s1795_s9, %s2646_s9  }
   0xd   : > { %s1339_s21 = sadd.s32 4294967294, %s1764_s19   ;;  %p47_p0 = scmp.ne.s32.totalorder %s1744_s14, %s1740_s13 }
   0xe   : > { %p48_p1 = scmp.eq.s32.totalorder %s1764_s19, 0  ;;  %p53_p2 = scmp.ne.s32.totalorder %s1740_s13, %s1736_s12 }
   0xf   : > { %p1855_p3 = scmp.eq.s32.totalorder %s1338_s20, 0  ;;  %p97_p5 = scmp.ne.s32.totalorder %s1732_s11, %s1728_s10 }
  0x10   : > { %p1860_p4 = por %p48_p1, %p47_p0  ;;  %p98_p7 = scmp.eq.s32.totalorder %s1338_s20, 7 }
  0x11   : > { %p1868_p6 = por %p1855_p3, %p53_p2  ;;  %p103_p8 = scmp.ne.s32.totalorder %s1728_s10, %s1724_s9 }
  0x12   : > { %p104_p9 = scmp.eq.s32.totalorder %s1339_s21, 7  ;;  %p1874_p10 = por %p98_p7, %p97_p5 }
  0x13   : > { %s2627_s26 = scalar_select %p1868_p6, 1, 0 }
  0x14   : > { %s2628_s27 = scalar_select %p1874_p10, 1, 0 }
  0x15   : > { %p1340_p11 = scmp.ge.s32.totalorder %s1764_s19, 1  ;;  %p1879_p12 = por %p104_p9, %p103_p8 }
  0x16   : > { %p111_p13 = scmp.lt.s32.totalorder %s1764_s19, 9  ;;  %s2631_s1 = sld [smem:[#allocation18_spill]] }
  0x17   : > { %s2629_s28 = scalar_select %p1879_p12, 1, 0 }
  0x18   : > { %p1887_p0 = pnand %p1340_p11, %p111_p13  ;;  %p1482_p2 = scmp.lt.s32.totalorder %s1764_s19, 8 }
  0x19   : > { %2630 = sst [smem:[#allocation15_spill]] %s2629_s28 }
  0x1a   : > { %s2632_s4 = scalar_select %p1887_p0, 1, 0 }
  0x1b   : > { %p1469_p1 = pneg %p1887_p0  ;;  %p1898_p7 = pnand %p1482_p2, %p1860_p4 }
  0x1c   : > { %s124_s3 = sshll.u32 %s2631_s1, 4  ;;  %s125_s3 = int_to_ptr.vmem [resolvable:$true] %s124_s3 }
  0x1d   : > { %p1470_p5 = pnand %p1469_p1, %p1855_p3  ;;  %s1593_s6 = scalar_lea.vmem %s125_s3, 16 }
  0x1e   : > { %p1594_p8 = scmp.ne.s32.totalorder %s125_s3, %s1593_s6  ;;  %p1601_p13 = scmp.lt.s32.totalorder %s125_s3, %s125_s3 }
  0x1f   : > { %p1595_p9 = pneg %p1470_p5  ;;  %p1602_p10 = scmp.lt.s32.totalorder %s1593_s6, %s1593_s6 }
  0x21   : > { %p1596_p12 = pnand %p1595_p9, %p1594_p8  ;;  %p1603_p6 = por %p1602_p10, %p1601_p13 }
  0x23   : > { %p1597_p11 = pneg %p1596_p12 }
  0x25   : > { %p1604_p0 = pnand %p1603_p6, %p1597_p11 }
  0x27   : > { %1607 = shalt.err (!%p1604_p0)
}
  0x28   : > { %s1766_s7 = smov [#allocation9]   ;;  %s28_s8 = sadd.s32 1, %s1756_s17 }
  0x29   : > { %1472 = dma.vmem_to_smem (!%p1470_p5), %s125_s3, 16, %s1766_s7, [#allocation8]  }
  0x2a   : > { %s31_s12 = sadd.s32 1, %s1760_s18  ;;  %p29_p4 = scmp.ge.s32.totalorder %s28_s8, 4 }
  0x2b   : > { %s135_s20 = sand.u32 1, %s1744_s14   ;;  %s1459_s29 = sshll.u32 %s1756_s17, 2 }
  0x2c   : > { %s1343_s21 = sshll.u32 %s135_s20, 5  ;;  %s2655_s8 = smov (%p29_p4, %s28_s8), 0 }
  0x2d   : > { %2634 = sst [smem:[#allocation16_spill]] %s2655_s8  ;;  %s2657_s12 = smov (!%p29_p4, %s31_s12), %s1760_s18 }
  0x2e   : > { %s36_s25 = ssub.s32 %s1756_s17, %s2655_s8  ;;  %p33_p6 = scmp.ge.s32.totalorder %s2657_s12, 2 }
  0x2f   : > { %s1346_s30 = sshll.u32 %s1760_s18, 4  ;;  %s139_s6 = scalar_lea.vmem [#allocation5], %s1343_s21 }
  0x30   : > { %s149_s3 = sshll.u32 %s139_s6, 4  ;;  %s2659_s12 = smov (%p33_p6, %s2657_s12), 0  ;;  %s1914_s3 = int_to_ptr.vmem [resolvable:$true] %s149_s3 }
  0x31   : > { %2635 = sst [smem:[#allocation17_spill]] %s2659_s12  ;;  %s146_s7 = sadd.s32 %s1459_s29, %s1346_s30 }
  0x32   : > { %s35_s22 = ssub.s32 %s1760_s18, %s2659_s12  ;;  %s1347_s24 = sshll.u32 %s146_s7, 7 }
  0x33   : > { %s37_s1 = sor.u32 %s36_s25, %s35_s22  ;;  %p85_p10 = scmp.eq.s32.totalorder %s35_s22, 0 }
  0x34   : > { %p38_p12 = scmp.eq.s32.totalorder %s37_s1, 0  ;;  %s1921_s17 = scalar_lea.hbm %s2613_s0, %s1347_s24 }
  0x35   : > { %s2636_s21 = sadd.s32 1, %s1732_s11  ;;  %s2637_s29 = sadd.s32 1, %s1744_s14 }
  0x36   : > { %s1926_s6 = scalar_select %p85_p10, %s1732_s11, %s2636_s21  }
  0x37   : > { %s1931_s30 = scalar_select %p38_p12, %s1744_s14, %s2637_s29  }
  0x38   : > { %s1933_s12 = scalar_lea.sflag [#allocation6], %s135_s20  ;;  %s1608_s25 = scalar_lea.hbm %s1921_s17, 512 }
  0x39   : > { %p1609_p0 = scmp.ne.s32.totalorder %s1921_s17, %s1608_s25  ;;  %p1610_p1 = pneg %p1898_p7 }
  0x3a   : > { %s1613_s24 = scalar_lea.hbm %s2613_s0, 4096  ;;  %p1614_p8 = scmp.lt.u32.totalorder %s1921_s17, %s2613_s0 }
  0x3b   : > { %p1611_p2 = pnand %p1610_p1, %p1609_p0  ;;  %p1615_p9 = scmp.lt.u32.totalorder %s1613_s24, %s1608_s25 }
  0x3c   : > { %p1617_p13 = scmp.lt.u32.totalorder %s1608_s25, %s1921_s17 }
  0x3d   : > { %p1612_p5 = pneg %p1611_p2  ;;  %p1616_p11 = por %p1615_p9, %p1614_p8 }
  0x3f   : > { %p1618_p4 = por %p1617_p13, %p1616_p11 }
  0x41   : > { %p1619_p6 = pnand %p1618_p4, %p1612_p5 }
  0x43   : > { %1622 = shalt.err (!%p1619_p6)
}
  0x44   : > { %s1623_s20 = scalar_lea.vmem %s1914_s3, 512  ;;  %s1767_s7 = smov [#allocation5]  }
  0x45   : > { %p1624_p10 = scmp.ne.s32.totalorder %s1914_s3, %s1623_s20  ;;  %s1628_s21 = sshll.u32 %s1767_s7, 4  ;;  %s1629_s21 = int_to_ptr.vmem [resolvable:$false] %s1628_s21 }
  0x46   : > { %s1630_s29 = scalar_lea.vmem %s1629_s21, 1024  ;;  %p1631_p2 = scmp.lt.s32.totalorder %s1914_s3, %s1629_s21 }
  0x47   : > { %p1626_p12 = pnand %p1624_p10, %p1610_p1  ;;  %p1632_p8 = scmp.lt.s32.totalorder %s1630_s29, %s1623_s20 }
  0x49   : > { %p1627_p0 = pneg %p1626_p12  ;;  %p1633_p9 = por %p1632_p8, %p1631_p2 }
  0x4b   : > { %p1634_p11 = pnand %p1633_p9, %p1627_p0 }
  0x4d   : > { %1637 = shalt.err (!%p1634_p11)
}
  0x4e   : > { %s1768_s25 = smov 128   ;;  %s1769_s1 = smov 8  }
  0x4f   : > { %1476 = dma.hbm_to_vmem [thread:$0]  (!%p1898_p7), %s1921_s17, 512, %s1914_s3, %s1933_s12, %s1768_s25, %s1768_s25, %s1769_s1  }
  0x50   : > { %p2638_p1 = scmp.ne.s32.totalorder %s2632_s4, 0 }
  0x51   : > { %s163_s22 = sand.u32 (!%p2638_p1), 1, %s1740_s13   ;;  %p2639_p5 = scmp.ne.s32.totalorder (!%p2638_p1), %s2627_s26, 0 }
  0x52   : > { %161 = sbr.rel (%p2638_p1) target bundleno = 631 (0x277), region = 28  ;;  %s1349_s24 = sshll.u32 (!%p2638_p1), %s163_s22, 5 }
  0x53   : > { %s164_s28 = scalar_lea.sflag (!%p2638_p1), [#allocation6], %s163_s22  ;;  %s167_s8 = scalar_lea.vmem (!%p2638_p1), [#allocation5], %s1349_s24 }
  0x59   : > { %1711 = dma.done.wait (%p2639_p5), %s164_s28, 512  }
  0x5a   : > { %1713 = vsyncadd (%p2639_p5), %s164_s28, 4294966784 }
  0x5b   : > { %1715 = dma.done.wait (%p1855_p3), [#allocation8], 16  }
  0x5c   : > { %1717 = vsyncadd (%p1855_p3), [#allocation8], 4294967280 }
  0x5d   : > { %176 = sfence }
  0x5e   : > { %s190_s17 = sand.u32 1, %s1728_s10   ;;  %v194_v0 = vld [vmem:[%s167_s8] sm:$0xff]  ;;  %v195_v1 = vld [vmem:[%s167_s8 + $0x8] sm:$0xff]  ;;  %v196_v2 = vld [vmem:[%s167_s8 + $0x10] sm:$0xff]  ;;  %vm198_vm0 = vcmask 261120   ;;  %p1352_p3 = scmp.ne.s32.totalorder %s1748_s15, 0 }
  0x5f   : > { %s1351_s4 = sshll.u32 %s190_s17, 4  ;;  %v197_v3 = vld [vmem:[%s167_s8 + $0x18] sm:$0xff]  ;;  %v199_v4 = vsel %vm198_vm0, %v194_v0, 0.0  ;;  %v200_v5 = vsel %vm198_vm0, %v196_v2, 0.0  ;;  %v202_v6 = vsel %vm198_vm0, %v195_v1, 0.0  ;;  %v205_v7 = vsel %vm198_vm0, %v194_v0, -inf }
  0x60   : > { %v201_v8 = vadd.f32 %v200_v5, %v199_v4  ;;  %v203_v9 = vsel %vm198_vm0, %v197_v3, 0.0  ;;  %v206_v10 = vsel %vm198_vm0, %v196_v2, -inf  ;;  %v208_v11 = vsel %vm198_vm0, %v195_v1, -inf  ;;  %s1983_s23 = scalar_lea.vmem [#allocation10], %s1351_s4  ;;  %214 = sbr.rel (%p1352_p3) target bundleno = 103 (0x67), region = 40 }
  0x61   : > { %v204_v12 = vadd.f32 %v203_v9, %v202_v6  ;;  %v207_v13 = vmax.f32 %v205_v7, %v206_v10  ;;  %v209_v14 = vsel %vm198_vm0, %v197_v3, -inf }
  0x62   : > { %v210_v15 = vmax.f32 %v208_v11, %v209_v14  ;;  %215 = vst.msk [vmem:[#allocation2] sm:$0xff] (!%p1352_p3), %vm198_vm0, %v201_v8 }
  0x63   : > { %216 = vst.msk [vmem:[#allocation2 + $0x8] sm:$0xff] (!%p1352_p3), %vm198_vm0, %v204_v12  ;;  %217 = vst.msk [vmem:[#allocation3] sm:$0xff] (!%p1352_p3), %vm198_vm0, %v207_v13 }
  0x64   : > { %218 = vst.msk [vmem:[#allocation3 + $0x8] sm:$0xff] (!%p1352_p3), %vm198_vm0, %v210_v15 }
  0x67 PF: > { %p1353_p7 = scmp.eq.s32.totalorder %s1748_s15, 0 }
  0x69   : > { %222 = sbr.rel (%p1353_p7) target bundleno = 112 (0x70), region = 44  ;;  %v223_v16 = vld [vmem:[#allocation2] sm:$0xff] (!%p1353_p7) }
  0x6a   : > { %v224_v17 = vld [vmem:[#allocation2 + $0x8] sm:$0xff] (!%p1353_p7)  ;;  %v229_v18 = vld [vmem:[#allocation3] sm:$0xff] (!%p1353_p7)  ;;  %v225_v19 = vadd.f32 (!%p1353_p7), %v223_v16, %v201_v8 }
  0x6b   : > { %v226_v20 = vadd.f32 (!%p1353_p7), %v224_v17, %v204_v12  ;;  %v231_v21 = vmax.f32 (!%p1353_p7), %v229_v18, %v207_v13  ;;  %v230_v22 = vld [vmem:[#allocation3 + $0x8] sm:$0xff] (!%p1353_p7) }
  0x6c   : > { %v232_v23 = vmax.f32 (!%p1353_p7), %v230_v22, %v210_v15  ;;  %227 = vst.msk [vmem:[#allocation2] sm:$0xff] (!%p1353_p7), %vm198_vm0, %v225_v19 }
  0x6d   : > { %228 = vst.msk [vmem:[#allocation2 + $0x8] sm:$0xff] (!%p1353_p7), %vm198_vm0, %v226_v20  ;;  %233 = vst.msk [vmem:[#allocation3] sm:$0xff] (!%p1353_p7), %vm198_vm0, %v231_v21 }
  0x6e   : > { %234 = vst.msk [vmem:[#allocation3 + $0x8] sm:$0xff] (!%p1353_p7), %vm198_vm0, %v232_v23 }
  0x70 PF: > { %p1354_p13 = scmp.ne.s32.totalorder %s1748_s15, 3 }
  0x71   : > { %vm247_vm1 = vcmask (!%p1354_p13), 1047808   ;;  %v1770_v27 = vmov (!%p1354_p13), 0.0   ;;  %s1771_s15 = smov (!%p1354_p13), 2   ;;  %s1772_s26 = smov (!%p1354_p13), 3  }
  0x72   : > { %238 = sbr.rel (%p1354_p13) target bundleno = 605 (0x25d), region = 48  ;;  %245 = vst [vmem:[#allocation4] sm:$0x7] (!%p1354_p13), %v1770_v27  ;;  %248 = vst.msk [vmem:[#allocation4 + $0x3] sm:$0xff] (!%p1354_p13), %vm247_vm1, %v1770_v27  ;;  %s1773_s5 = smov (!%p1354_p13), 1  }
  0x73   : > { %v239_v24 = vld [vmem:[#allocation2] sm:$0xff] (!%p1354_p13)  ;;  %246 = vst [vmem:[#allocation4 + $0x13] sm:$0x7] (!%p1354_p13), %v1770_v27  ;;  %249 = vst.msk [vmem:[#allocation4 + $0xb] sm:$0xff] (!%p1354_p13), %vm247_vm1, %v1770_v27  ;;  %s1774_s12 = smov (!%p1354_p13), 127   ;;  %s1775_s3 = smov (!%p1354_p13), 126  }
  0x74   : > { %v240_v25 = vld [vmem:[#allocation2 + $0x8] sm:$0xff] (!%p1354_p13)  ;;  %v241_v26 = vmul.f32 (!%p1354_p13), 0.125, %v239_v24  ;;  %253 = vst [vmem:[#allocation4 + $0x18] sm:$0x7] (!%p1354_p13), %v1770_v27  ;;  %254 = vst [vmem:[#allocation4 + $0x2b] sm:$0x7] (!%p1354_p13), %v1770_v27 }
  0x75   : > { %255 = vst.msk [vmem:[#allocation4 + $0x1b] sm:$0xff] (!%p1354_p13), %vm247_vm1, %v1770_v27  ;;  %256 = vst.msk [vmem:[#allocation4 + $0x23] sm:$0xff] (!%p1354_p13), %vm247_vm1, %v1770_v27  ;;  %v242_v28 = vmul.f32 (!%p1354_p13), 0.125, %v240_v25  ;;  %s1776_s20 = smov (!%p1354_p13), 125   ;;  %v243_v33 = vld [vmem:[#allocation3] sm:$0xff] (!%p1354_p13)  ;;  %v244_v34 = vld [vmem:[#allocation3 + $0x8] sm:$0xff] (!%p1354_p13) }
  0x76   : > { %250 = vst.msk [vmem:[#allocation4 + $0x3] sm:$0xff] (!%p1354_p13), %vm198_vm0, %v241_v26  ;;  %257 = vst.msk [vmem:[#allocation4 + $0x1b] sm:$0xff] (!%p1354_p13), %vm198_vm0, %v243_v33  ;;  %s1355_s7 = sld [smem:[#allocation9 + $0x1]] (!%p1354_p13)  ;;  %s261_s21 = sld [smem:[#allocation9]] (!%p1354_p13) }
  0x77   : > { %251 = vst.msk [vmem:[#allocation4 + $0xb] sm:$0xff] (!%p1354_p13), %vm198_vm0, %v242_v28  ;;  %258 = vst.msk [vmem:[#allocation4 + $0x23] sm:$0xff] (!%p1354_p13), %vm198_vm0, %v244_v34  ;;  %s1356_s29 = sld [smem:[#allocation9 + $0x2]] (!%p1354_p13)  ;;  %s1357_s25 = sld [smem:[#allocation9 + $0x3]] (!%p1354_p13) }
  0x78   : > { %s2152_s1 = sld [smem:[#allocation9 + $0x4]] (!%p1354_p13)  ;;  %s2154_s22 = sld [smem:[#allocation9 + $0x5]] (!%p1354_p13) }
  0x79   : > { %s2160_s24 = sld [smem:[#allocation9 + $0x6]]  ;;  %s2162_s28 = sld [smem:[#allocation9 + $0x7]] }
  0x7a   : > { %s2171_s8 = sld [smem:[#allocation9 + $0x8]]  ;;  %s2174_s4 = sld [smem:[#allocation9 + $0xa]] }
  0x7c   : > { %v276_v47 = vstv %s1355_s7  ;;  %v266_v48 = vstv %s261_s21  ;;  %s2181_s7 = sld [smem:[#allocation9 + $0x9]]  ;;  %s1365_s21 = sld [smem:[#allocation9 + $0xb]] }
  0x7d   : > { %v1998_v29 = vld [vmem:[#allocation4] sm:$0xff]  ;;  %v286_v51 = vstv %s1356_s29  ;;  %v292_v60 = vstv %s1357_s25  ;;  %s1366_s29 = sld [smem:[#allocation9 + $0xc]]  ;;  %s1367_s25 = sld [smem:[#allocation9 + $0xd]] }
  0x7e   : > { %272 = vrot.lane.b32.xlu1 %v1998_v29, %s1771_s15  ;;  %262 = vrot.lane.b32.xlu0 %v1998_v29, %s1772_s26  ;;  %v2004_v30 = vld [vmem:[#allocation4 + $0x8] sm:$0xff]  ;;  %v293_v4 = vmul.f32 %v292_v60, %v1998_v29  ;;  %v302_v5 = vstv %s2152_s1  ;;  %v312_v6 = vstv %s2154_s22  ;;  %s1368_s1 = sld [smem:[#allocation9 + $0xe]]  ;;  %s2213_s22 = sld [smem:[#allocation9 + $0xf]] }
  0x7f   : > { %v2026_v31 = vld [vmem:[#allocation4 + $0x9] sm:$0xff]  ;;  %v2028_v32 = vld [vmem:[#allocation4 + $0x1] sm:$0xff]  ;;  %v294_v1 = vmul.f32 %v292_v60, %v2004_v30  ;;  %v322_v13 = vstv %s2160_s24  ;;  %v334_v16 = vstv %s2162_s28  ;;  %s2215_s24 = sld [smem:[#allocation9 + $0x11]]  ;;  %s2221_s28 = sld [smem:[#allocation9 + $0x10]] }
  0x80   : > { %v2056_v35 = vld [vmem:[#allocation4 + $0xa] sm:$0xff]  ;;  %v2058_v36 = vld [vmem:[#allocation4 + $0x2] sm:$0xff]  ;;  %v344_v23 = vstv %s2171_s8  ;;  %v360_v34 = vstv %s2174_s4  ;;  %s1372_s8 = sld [smem:[#allocation9 + $0x12]]  ;;  %s1373_s4 = sld [smem:[#allocation9 + $0x13]] }
  0x81   : > { %v2084_v37 = vld [vmem:[#allocation4 + $0xb] sm:$0xff]  ;;  %v2086_v38 = vld [vmem:[#allocation4 + $0x3] sm:$0xff] }
  0x82   : > { %274 = vrot.lane.b32.xlu1 %v2004_v30, %s1771_s15  ;;  %264 = vrot.lane.b32.xlu0 %v2004_v30, %s1772_s26  ;;  %v2112_v39 = vld [vmem:[#allocation4 + $0xc] sm:$0xff]  ;;  %v2114_v40 = vld [vmem:[#allocation4 + $0x4] sm:$0xff] }
  0x83   : > { %v2140_v43 = vld [vmem:[#allocation4 + $0xd] sm:$0xff]  ;;  %v2142_v44 = vld [vmem:[#allocation4 + $0x5] sm:$0xff] }
  0x84   : > { %v2189_v28 = vld [vmem:[#allocation4 + $0xe] sm:$0xff] }
  0x86   : > { %284 = vrot.lane.b32.xlu1 %v2004_v30, %s1773_s5  ;;  %282 = vrot.lane.b32.xlu0 %v1998_v29, %s1773_s5 }
  0x8a   : > { %300 = vrot.lane.b32.xlu1 %v2004_v30, %s1774_s12  ;;  %298 = vrot.lane.b32.xlu0 %v1998_v29, %s1774_s12 }
  0x8e   : > { %310 = vrot.lane.b32.xlu1 %v2004_v30, %s1775_s3  ;;  %308 = vrot.lane.b32.xlu0 %v1998_v29, %s1775_s3 }
  0x92   : > { %320 = vrot.lane.b32.xlu1 %v2004_v30, %s1776_s20  ;;  %318 = vrot.lane.b32.xlu0 %v1998_v29, %s1776_s20  ;;  %v2191_v29 = vld [vmem:[#allocation4 + $0x6] sm:$0xff] }
  0x96   : > { %332 = vrot.lane.b32.xlu1 %v2026_v31, %s1772_s26  ;;  %330 = vrot.lane.b32.xlu0 %v2028_v32, %s1772_s26 }
  0x9a   : > { %342 = vrot.lane.b32.xlu1 %v2026_v31, %s1771_s15  ;;  %340 = vrot.lane.b32.xlu0 %v2028_v32, %s1771_s15 }
  0x9e   : > { %352 = vrot.lane.b32.xlu1 %v2026_v31, %s1773_s5  ;;  %350 = vrot.lane.b32.xlu0 %v2028_v32, %s1773_s5 }
  0xa2   : > { %368 = vrot.lane.b32.xlu1 %v2026_v31, %s1774_s12  ;;  %366 = vrot.lane.b32.xlu0 %v2028_v32, %s1774_s12 }
  0xa6   : > { %378 = vrot.lane.b32.xlu1 %v2026_v31, %s1775_s3  ;;  %376 = vrot.lane.b32.xlu0 %v2028_v32, %s1775_s3 }
  0xaa   : > { %388 = vrot.lane.b32.xlu1 %v2026_v31, %s1776_s20  ;;  %386 = vrot.lane.b32.xlu0 %v2028_v32, %s1776_s20 }
  0xae   : > { %400 = vrot.lane.b32.xlu1 %v2056_v35, %s1772_s26  ;;  %398 = vrot.lane.b32.xlu0 %v2058_v36, %s1772_s26 }
  0xb2   : > { %410 = vrot.lane.b32.xlu1 %v2056_v35, %s1771_s15  ;;  %408 = vrot.lane.b32.xlu0 %v2058_v36, %s1771_s15 }
  0xb6   : > { %420 = vrot.lane.b32.xlu1 %v2056_v35, %s1773_s5  ;;  %418 = vrot.lane.b32.xlu0 %v2058_v36, %s1773_s5 }
  0xba   : > { %436 = vrot.lane.b32.xlu1 %v2056_v35, %s1774_s12  ;;  %434 = vrot.lane.b32.xlu0 %v2058_v36, %s1774_s12 }
  0xbe   : > { %446 = vrot.lane.b32.xlu1 %v2056_v35, %s1775_s3  ;;  %444 = vrot.lane.b32.xlu0 %v2058_v36, %s1775_s3 }
  0xc2   : > { %456 = vrot.lane.b32.xlu1 %v2056_v35, %s1776_s20  ;;  %454 = vrot.lane.b32.xlu0 %v2058_v36, %s1776_s20 }
  0xc6   : > { %468 = vrot.lane.b32.xlu1 %v2084_v37, %s1772_s26  ;;  %466 = vrot.lane.b32.xlu0 %v2086_v38, %s1772_s26 }
  0xca   : > { %478 = vrot.lane.b32.xlu1 %v2084_v37, %s1771_s15  ;;  %476 = vrot.lane.b32.xlu0 %v2086_v38, %s1771_s15 }
  0xce   : > { %488 = vrot.lane.b32.xlu1 %v2084_v37, %s1773_s5  ;;  %486 = vrot.lane.b32.xlu0 %v2086_v38, %s1773_s5 }
  0xd2   : > { %504 = vrot.lane.b32.xlu1 %v2084_v37, %s1774_s12  ;;  %502 = vrot.lane.b32.xlu0 %v2086_v38, %s1774_s12 }
  0xd6   : > { %514 = vrot.lane.b32.xlu1 %v2084_v37, %s1775_s3  ;;  %512 = vrot.lane.b32.xlu0 %v2086_v38, %s1775_s3 }
  0xda   : > { %524 = vrot.lane.b32.xlu1 %v2084_v37, %s1776_s20  ;;  %522 = vrot.lane.b32.xlu0 %v2086_v38, %s1776_s20 }
  0xde   : > { %536 = vrot.lane.b32.xlu1 %v2112_v39, %s1772_s26  ;;  %534 = vrot.lane.b32.xlu0 %v2114_v40, %s1772_s26 }
  0xe2   : > { %546 = vrot.lane.b32.xlu1 %v2112_v39, %s1771_s15  ;;  %544 = vrot.lane.b32.xlu0 %v2114_v40, %s1771_s15 }
  0xe6   : > { %556 = vrot.lane.b32.xlu1 %v2112_v39, %s1773_s5  ;;  %554 = vrot.lane.b32.xlu0 %v2114_v40, %s1773_s5 }
  0xea   : > { %572 = vrot.lane.b32.xlu1 %v2112_v39, %s1774_s12  ;;  %570 = vrot.lane.b32.xlu0 %v2114_v40, %s1774_s12 }
  0xee   : > { %582 = vrot.lane.b32.xlu1 %v2112_v39, %s1775_s3  ;;  %580 = vrot.lane.b32.xlu0 %v2114_v40, %s1775_s3 }
  0xf0   : > { %v273_v41 = vpop.permute.xlu1 %272  ;;  %v263_v42 = vpop.permute.xlu0 %262 }
  0xf1   : > { %v277_v52 = vmul.f32 %v276_v47, %v273_v41  ;;  %v267_v53 = vmul.f32 %v266_v48, %v263_v42 }
  0xf2   : > { %592 = vrot.lane.b32.xlu1 %v2112_v39, %s1776_s20  ;;  %590 = vrot.lane.b32.xlu0 %v2114_v40, %s1776_s20 }
  0xf3   : > { %v279_v61 = vadd.f32 %v277_v52, %v267_v53  ;;  %v361_v52 = vmul.f32 %v360_v34, %v2028_v32 }
  0xf4   : > { %v275_v45 = vpop.permute.xlu1 %274  ;;  %v265_v46 = vpop.permute.xlu0 %264 }
  0xf5   : > { %v278_v54 = vmul.f32 %v276_v47, %v275_v45  ;;  %v268_v55 = vmul.f32 %v266_v48, %v265_v46  ;;  %v354_v47 = vstv %s2181_s7  ;;  %s1374_s7 = sld [smem:[#allocation9 + $0x14]] }
  0xf6   : > { %604 = vrot.lane.b32.xlu1 %v2140_v43, %s1772_s26  ;;  %602 = vrot.lane.b32.xlu0 %v2142_v44, %s1772_s26 }
  0xf7   : > { %v280_v62 = vadd.f32 %v278_v54, %v268_v55 }
  0xf8   : > { %v285_v49 = vpop.permute.xlu1 %284  ;;  %v283_v50 = vpop.permute.xlu0 %282 }
  0xf9   : > { %v288_v58 = vmul.f32 %v286_v51, %v285_v49  ;;  %v287_v59 = vmul.f32 %v286_v51, %v283_v50  ;;  %v362_v50 = vmul.f32 %v360_v34, %v2026_v31  ;;  %v422_v34 = vstv %s2221_s28  ;;  %s1381_s28 = sld [smem:[#allocation9 + $0x1b]] }
  0xfa   : > { %614 = vrot.lane.b32.xlu1 %v2140_v43, %s1771_s15  ;;  %612 = vrot.lane.b32.xlu0 %v2142_v44, %s1771_s15 }
  0xfb   : > { %v290_v2 = vadd.f32 %v288_v58, %v280_v62  ;;  %v289_v3 = vadd.f32 %v287_v59, %v279_v61 }
  0xfc   : > { %v301_v56 = vpop.permute.xlu1 %300  ;;  %v299_v57 = vpop.permute.xlu0 %298 }
  0xfd   : > { %v296_v9 = vadd.f32 %v294_v1, %v290_v2  ;;  %v295_v10 = vadd.f32 %v293_v4, %v289_v3  ;;  %v304_v11 = vmul.f32 %v302_v5, %v301_v56  ;;  %v303_v12 = vmul.f32 %v302_v5, %v299_v57 }
  0xfe   : > { %624 = vrot.lane.b32.xlu1 %v2140_v43, %s1773_s5  ;;  %622 = vrot.lane.b32.xlu0 %v2142_v44, %s1773_s5  ;;  %v380_v1 = vstv %s1366_s29  ;;  %s2252_s29 = sld [smem:[#allocation9 + $0x16]] }
  0xff   : > { %v306_v19 = vadd.f32 %v304_v11, %v296_v9  ;;  %v305_v20 = vadd.f32 %v303_v12, %v295_v10  ;;  %v402_v9 = vstv %s1368_s1  ;;  %s2260_s1 = sld [smem:[#allocation9 + $0x17]] }
 0x100   : > { %v311_v63 = vpop.permute.xlu1 %310  ;;  %v309_v0 = vpop.permute.xlu0 %308 }
 0x101   : > { %v314_v14 = vmul.f32 %v312_v6, %v311_v63  ;;  %v313_v15 = vmul.f32 %v312_v6, %v309_v0  ;;  %v370_v0 = vstv %s1365_s21  ;;  %v390_v6 = vstv %s1367_s25  ;;  %s1375_s21 = sld [smem:[#allocation9 + $0x15]]  ;;  %s2254_s25 = sld [smem:[#allocation9 + $0x18]] }
 0x102   : > { %640 = vrot.lane.b32.xlu1 %v2140_v43, %s1774_s12  ;;  %638 = vrot.lane.b32.xlu0 %v2142_v44, %s1774_s12 }
 0x103   : > { %v316_v24 = vadd.f32 %v314_v14, %v306_v19  ;;  %v315_v25 = vadd.f32 %v313_v15, %v305_v20 }
 0x104   : > { %v321_v7 = vpop.permute.xlu1 %320  ;;  %v319_v8 = vpop.permute.xlu0 %318 }
 0x105   : > { %v324_v21 = vmul.f32 %v322_v13, %v321_v7  ;;  %v323_v22 = vmul.f32 %v322_v13, %v319_v8 }
 0x106   : > { %650 = vrot.lane.b32.xlu1 %v2140_v43, %s1775_s3  ;;  %648 = vrot.lane.b32.xlu0 %v2142_v44, %s1775_s3 }
 0x107   : > { %v326_v41 = vadd.f32 %v324_v21, %v316_v24  ;;  %v325_v42 = vadd.f32 %v323_v22, %v315_v25  ;;  %v2228_v21 = vld [vmem:[#allocation4 + $0x20] sm:$0xff]  ;;  %v2230_v22 = vld [vmem:[#allocation4 + $0x18] sm:$0xff]  ;;  %v428_v25 = vstv %s2215_s24  ;;  %s1380_s24 = sld [smem:[#allocation9 + $0x1a]] }
 0x108   : > { %v333_v17 = vpop.permute.xlu1 %332  ;;  %v331_v18 = vpop.permute.xlu0 %330 }
 0x109   : > { %v336_v26 = vmul.f32 %v334_v16, %v333_v17  ;;  %v335_v27 = vmul.f32 %v334_v16, %v331_v18  ;;  %v412_v16 = vstv %s2213_s22  ;;  %s1379_s22 = sld [smem:[#allocation9 + $0x19]] }
 0x10a   : > { %660 = vrot.lane.b32.xlu1 %v2140_v43, %s1776_s20  ;;  %658 = vrot.lane.b32.xlu0 %v2142_v44, %s1776_s20 }
 0x10b   : > { %v338_v48 = vadd.f32 %v336_v26, %v326_v41  ;;  %v337_v49 = vadd.f32 %v335_v27, %v325_v42 }
 0x10c   : > { %v343_v30 = vpop.permute.xlu1 %342  ;;  %v341_v33 = vpop.permute.xlu0 %340 }
 0x10d   : > { %v346_v45 = vmul.f32 %v344_v23, %v343_v30  ;;  %v345_v46 = vmul.f32 %v344_v23, %v341_v33 }
 0x10e   : > { %672 = vrot.lane.b32.xlu1 %v2189_v28, %s1772_s26  ;;  %670 = vrot.lane.b32.xlu0 %v2191_v29, %s1772_s26 }
 0x10f   : > { %v348_v54 = vadd.f32 %v346_v45, %v338_v48  ;;  %v347_v55 = vadd.f32 %v345_v46, %v337_v49  ;;  %v430_v45 = vmul.f32 %v428_v25, %v2056_v35 }
 0x110   : > { %v353_v51 = vpop.permute.xlu1 %352  ;;  %v351_v53 = vpop.permute.xlu0 %350 }
 0x111   : > { %v356_v56 = vmul.f32 %v354_v47, %v353_v51  ;;  %v355_v57 = vmul.f32 %v354_v47, %v351_v53  ;;  %v429_v47 = vmul.f32 %v428_v25, %v2058_v36  ;;  %v490_v25 = vstv %s2260_s1  ;;  %s1388_s1 = sld [smem:[#allocation9 + $0x22]] }
 0x112   : > { %682 = vrot.lane.b32.xlu1 %v2189_v28, %s1771_s15  ;;  %680 = vrot.lane.b32.xlu0 %v2191_v29, %s1771_s15 }
 0x113   : > { %v358_v58 = vadd.f32 %v356_v56, %v348_v54  ;;  %v357_v59 = vadd.f32 %v355_v57, %v347_v55 }
 0x114   : > { %v369_v60 = vpop.permute.xlu1 %368  ;;  %v367_v61 = vpop.permute.xlu0 %366 }
 0x115   : > { %v364_v31 = vadd.f32 %v362_v50, %v358_v58  ;;  %v363_v62 = vadd.f32 %v361_v52, %v357_v59  ;;  %v372_v4 = vmul.f32 %v370_v0, %v369_v60  ;;  %v371_v5 = vmul.f32 %v370_v0, %v367_v61 }
 0x116   : > { %692 = vrot.lane.b32.xlu1 %v2189_v28, %s1773_s5  ;;  %690 = vrot.lane.b32.xlu0 %v2191_v29, %s1773_s5  ;;  %v438_v59 = vstv %s1372_s8  ;;  %v448_v60 = vstv %s1373_s4  ;;  %s1382_s8 = sld [smem:[#allocation9 + $0x1c]]  ;;  %s2291_s4 = sld [smem:[#allocation9 + $0x1d]] }
 0x117   : > { %v374_v12 = vadd.f32 %v372_v4, %v364_v31  ;;  %v373_v13 = vadd.f32 %v371_v5, %v363_v62 }
 0x118   : > { %v379_v32 = vpop.permute.xlu1 %378  ;;  %v377_v63 = vpop.permute.xlu0 %376 }
 0x119   : > { %v382_v7 = vmul.f32 %v380_v1, %v379_v32  ;;  %v381_v8 = vmul.f32 %v380_v1, %v377_v63  ;;  %v458_v63 = vstv %s1374_s7  ;;  %s2293_s7 = sld [smem:[#allocation9 + $0x1f]] }
 0x11a   : > { %708 = vrot.lane.b32.xlu1 %v2189_v28, %s1774_s12  ;;  %706 = vrot.lane.b32.xlu0 %v2191_v29, %s1774_s12 }
 0x11b   : > { %v384_v17 = vadd.f32 %v382_v7, %v374_v12  ;;  %v383_v18 = vadd.f32 %v381_v8, %v373_v13 }
 0x11c   : > { %v389_v2 = vpop.permute.xlu1 %388  ;;  %v387_v3 = vpop.permute.xlu0 %386 }
 0x11d   : > { %v392_v14 = vmul.f32 %v390_v6, %v389_v2  ;;  %v391_v15 = vmul.f32 %v390_v6, %v387_v3  ;;  %v470_v2 = vstv %s1375_s21  ;;  %s2299_s21 = sld [smem:[#allocation9 + $0x1e]] }
 0x11e   : > { %718 = vrot.lane.b32.xlu1 %v2189_v28, %s1775_s3  ;;  %716 = vrot.lane.b32.xlu0 %v2191_v29, %s1775_s3 }
 0x11f   : > { %v394_v26 = vadd.f32 %v392_v14, %v384_v17  ;;  %v393_v27 = vadd.f32 %v391_v15, %v383_v18  ;;  %v2267_v14 = vld [vmem:[#allocation4 + $0x21] sm:$0xff]  ;;  %v2269_v15 = vld [vmem:[#allocation4 + $0x19] sm:$0xff]  ;;  %v496_v18 = vstv %s2254_s25  ;;  %s1387_s25 = sld [smem:[#allocation9 + $0x21]] }
 0x120   : > { %v401_v10 = vpop.permute.xlu1 %400  ;;  %v399_v11 = vpop.permute.xlu0 %398 }
 0x121   : > { %v404_v19 = vmul.f32 %v402_v9, %v401_v10  ;;  %v403_v20 = vmul.f32 %v402_v9, %v399_v11  ;;  %v480_v9 = vstv %s2252_s29  ;;  %s1386_s29 = sld [smem:[#allocation9 + $0x20]] }
 0x122   : > { %728 = vrot.lane.b32.xlu1 %v2189_v28, %s1776_s20  ;;  %726 = vrot.lane.b32.xlu0 %v2191_v29, %s1776_s20 }
 0x123   : > { %v406_v41 = vadd.f32 %v404_v19, %v394_v26  ;;  %v405_v42 = vadd.f32 %v403_v20, %v393_v27 }
 0x124   : > { %v411_v23 = vpop.permute.xlu1 %410  ;;  %v409_v24 = vpop.permute.xlu0 %408 }
 0x125   : > { %v414_v30 = vmul.f32 %v412_v16, %v411_v23  ;;  %v413_v33 = vmul.f32 %v412_v16, %v409_v24 }
 0x126   : > { %740 = vrot.lane.b32.xlu1 %v2228_v21, %s1772_s26  ;;  %738 = vrot.lane.b32.xlu0 %v2230_v22, %s1772_s26 }
 0x127   : > { %v416_v49 = vadd.f32 %v414_v30, %v406_v41  ;;  %v415_v50 = vadd.f32 %v413_v33, %v405_v42  ;;  %v498_v30 = vmul.f32 %v496_v18, %v2084_v37 }
 0x128   : > { %v421_v46 = vpop.permute.xlu1 %420  ;;  %v419_v48 = vpop.permute.xlu0 %418 }
 0x129   : > { %v424_v51 = vmul.f32 %v422_v34, %v421_v46  ;;  %v423_v52 = vmul.f32 %v422_v34, %v419_v48  ;;  %v497_v34 = vmul.f32 %v496_v18, %v2086_v38  ;;  %v558_v18 = vstv %s2299_s21  ;;  %s1395_s21 = sld [smem:[#allocation9 + $0x29]] }
 0x12a   : > { %750 = vrot.lane.b32.xlu1 %v2228_v21, %s1771_s15  ;;  %748 = vrot.lane.b32.xlu0 %v2230_v22, %s1771_s15 }
 0x12b   : > { %v426_v53 = vadd.f32 %v424_v51, %v416_v49  ;;  %v425_v54 = vadd.f32 %v423_v52, %v415_v50 }
 0x12c   : > { %v437_v55 = vpop.permute.xlu1 %436  ;;  %v435_v56 = vpop.permute.xlu0 %434 }
 0x12d   : > { %v432_v35 = vadd.f32 %v430_v45, %v426_v53  ;;  %v431_v57 = vadd.f32 %v429_v47, %v425_v54  ;;  %v440_v62 = vmul.f32 %v438_v59, %v437_v55  ;;  %v439_v32 = vmul.f32 %v438_v59, %v435_v56 }
 0x12e   : > { %760 = vrot.lane.b32.xlu1 %v2228_v21, %s1773_s5  ;;  %758 = vrot.lane.b32.xlu0 %v2230_v22, %s1773_s5  ;;  %v506_v54 = vstv %s1379_s22  ;;  %v516_v55 = vstv %s1380_s24  ;;  %s1389_s22 = sld [smem:[#allocation9 + $0x23]]  ;;  %s2330_s24 = sld [smem:[#allocation9 + $0x24]] }
 0x12f   : > { %v442_v5 = vadd.f32 %v440_v62, %v432_v35  ;;  %v441_v6 = vadd.f32 %v439_v32, %v431_v57 }
 0x130   : > { %v447_v36 = vpop.permute.xlu1 %446  ;;  %v445_v58 = vpop.permute.xlu0 %444 }
 0x131   : > { %v450_v0 = vmul.f32 %v448_v60, %v447_v36  ;;  %v449_v1 = vmul.f32 %v448_v60, %v445_v58  ;;  %v526_v58 = vstv %s1381_s28  ;;  %s2332_s28 = sld [smem:[#allocation9 + $0x26]] }
 0x132   : > { %776 = vrot.lane.b32.xlu1 %v2228_v21, %s1774_s12  ;;  %774 = vrot.lane.b32.xlu0 %v2230_v22, %s1774_s12 }
 0x133   : > { %v452_v10 = vadd.f32 %v450_v0, %v442_v5  ;;  %v451_v11 = vadd.f32 %v449_v1, %v441_v6 }
 0x134   : > { %v457_v61 = vpop.permute.xlu1 %456  ;;  %v455_v31 = vpop.permute.xlu0 %454 }
 0x135   : > { %v460_v7 = vmul.f32 %v458_v63, %v457_v61  ;;  %v459_v8 = vmul.f32 %v458_v63, %v455_v31  ;;  %v538_v61 = vstv %s1382_s8  ;;  %s2338_s8 = sld [smem:[#allocation9 + $0x25]] }
 0x136   : > { %786 = vrot.lane.b32.xlu1 %v2228_v21, %s1775_s3  ;;  %784 = vrot.lane.b32.xlu0 %v2230_v22, %s1775_s3 }
 0x137   : > { %v462_v19 = vadd.f32 %v460_v7, %v452_v10  ;;  %v461_v20 = vadd.f32 %v459_v8, %v451_v11  ;;  %v2306_v7 = vld [vmem:[#allocation4 + $0x22] sm:$0xff]  ;;  %v2308_v8 = vld [vmem:[#allocation4 + $0x1a] sm:$0xff]  ;;  %v564_v11 = vstv %s2293_s7  ;;  %s1394_s7 = sld [smem:[#allocation9 + $0x28]] }
 0x138   : > { %v469_v3 = vpop.permute.xlu1 %468  ;;  %v467_v4 = vpop.permute.xlu0 %466 }
 0x139   : > { %v472_v12 = vmul.f32 %v470_v2, %v469_v3  ;;  %v471_v13 = vmul.f32 %v470_v2, %v467_v4  ;;  %v548_v2 = vstv %s2291_s4  ;;  %s2350_s4 = sld [smem:[#allocation9 + $0x27]] }
 0x13a   : > { %796 = vrot.lane.b32.xlu1 %v2228_v21, %s1776_s20  ;;  %794 = vrot.lane.b32.xlu0 %v2230_v22, %s1776_s20 }
 0x13b   : > { %v474_v26 = vadd.f32 %v472_v12, %v462_v19  ;;  %v473_v27 = vadd.f32 %v471_v13, %v461_v20 }
 0x13c   : > { %v479_v16 = vpop.permute.xlu1 %478  ;;  %v477_v17 = vpop.permute.xlu0 %476 }
 0x13d   : > { %v482_v23 = vmul.f32 %v480_v9, %v479_v16  ;;  %v481_v24 = vmul.f32 %v480_v9, %v477_v17 }
 0x13e   : > { %808 = vrot.lane.b32.xlu1 %v2267_v14, %s1772_s26  ;;  %806 = vrot.lane.b32.xlu0 %v2269_v15, %s1772_s26 }
 0x13f   : > { %v484_v42 = vadd.f32 %v482_v23, %v474_v26  ;;  %v483_v45 = vadd.f32 %v481_v24, %v473_v27  ;;  %v566_v23 = vmul.f32 %v564_v11, %v2112_v39 }
 0x140   : > { %v489_v33 = vpop.permute.xlu1 %488  ;;  %v487_v41 = vpop.permute.xlu0 %486 }
 0x141   : > { %v492_v46 = vmul.f32 %v490_v25, %v489_v33  ;;  %v491_v47 = vmul.f32 %v490_v25, %v487_v41  ;;  %v565_v25 = vmul.f32 %v564_v11, %v2114_v40  ;;  %v626_v11 = vstv %s2338_s8  ;;  %s1402_s8 = sld [smem:[#allocation9 + $0x30]] }
 0x142   : > { %818 = vrot.lane.b32.xlu1 %v2267_v14, %s1771_s15  ;;  %816 = vrot.lane.b32.xlu0 %v2269_v15, %s1771_s15 }
 0x143   : > { %v494_v48 = vadd.f32 %v492_v46, %v484_v42  ;;  %v493_v49 = vadd.f32 %v491_v47, %v483_v45 }
 0x144   : > { %v505_v50 = vpop.permute.xlu1 %504  ;;  %v503_v51 = vpop.permute.xlu0 %502 }
 0x145   : > { %v500_v37 = vadd.f32 %v498_v30, %v494_v48  ;;  %v499_v52 = vadd.f32 %v497_v34, %v493_v49  ;;  %v508_v57 = vmul.f32 %v506_v54, %v505_v50  ;;  %v507_v36 = vmul.f32 %v506_v54, %v503_v51 }
 0x146   : > { %828 = vrot.lane.b32.xlu1 %v2267_v14, %s1773_s5  ;;  %826 = vrot.lane.b32.xlu0 %v2269_v15, %s1773_s5  ;;  %v574_v49 = vstv %s1386_s29  ;;  %v584_v50 = vstv %s1387_s25  ;;  %s1396_s29 = sld [smem:[#allocation9 + $0x2a]]  ;;  %s2372_s25 = sld [smem:[#allocation9 + $0x2b]] }
 0x147   : > { %v510_v32 = vadd.f32 %v508_v57, %v500_v37  ;;  %v509_v63 = vadd.f32 %v507_v36, %v499_v52 }
 0x148   : > { %v515_v38 = vpop.permute.xlu1 %514  ;;  %v513_v53 = vpop.permute.xlu0 %512 }
 0x149   : > { %v518_v59 = vmul.f32 %v516_v55, %v515_v38  ;;  %v517_v60 = vmul.f32 %v516_v55, %v513_v53  ;;  %v594_v53 = vstv %s1388_s1  ;;  %s2378_s1 = sld [smem:[#allocation9 + $0x2c]] }
 0x14a   : > { %844 = vrot.lane.b32.xlu1 %v2267_v14, %s1774_s12  ;;  %842 = vrot.lane.b32.xlu0 %v2269_v15, %s1774_s12 }
 0x14b   : > { %v520_v3 = vadd.f32 %v518_v59, %v510_v32  ;;  %v519_v4 = vadd.f32 %v517_v60, %v509_v63 }
 0x14c   : > { %v525_v56 = vpop.permute.xlu1 %524  ;;  %v523_v35 = vpop.permute.xlu0 %522 }
 0x14d   : > { %v528_v0 = vmul.f32 %v526_v58, %v525_v56  ;;  %v527_v1 = vmul.f32 %v526_v58, %v523_v35  ;;  %v606_v56 = vstv %s1389_s22  ;;  %s1399_s22 = sld [smem:[#allocation9 + $0x2d]] }
 0x14e   : > { %854 = vrot.lane.b32.xlu1 %v2267_v14, %s1775_s3  ;;  %852 = vrot.lane.b32.xlu0 %v2269_v15, %s1775_s3 }
 0x14f   : > { %v530_v12 = vadd.f32 %v528_v0, %v520_v3  ;;  %v529_v13 = vadd.f32 %v527_v1, %v519_v4  ;;  %v2345_v0 = vld [vmem:[#allocation4 + $0x23] sm:$0xff]  ;;  %v2347_v1 = vld [vmem:[#allocation4 + $0x1b] sm:$0xff]  ;;  %v632_v4 = vstv %s2332_s28  ;;  %s1401_s28 = sld [smem:[#allocation9 + $0x2f]] }
 0x150   : > { %v537_v31 = vpop.permute.xlu1 %536  ;;  %v535_v62 = vpop.permute.xlu0 %534 }
 0x151   : > { %v540_v5 = vmul.f32 %v538_v61, %v537_v31  ;;  %v539_v6 = vmul.f32 %v538_v61, %v535_v62  ;;  %v616_v61 = vstv %s2330_s24  ;;  %s2385_s24 = sld [smem:[#allocation9 + $0x2e]] }
 0x152   : > { %864 = vrot.lane.b32.xlu1 %v2267_v14, %s1776_s20  ;;  %862 = vrot.lane.b32.xlu0 %v2269_v15, %s1776_s20 }
 0x153   : > { %v542_v19 = vadd.f32 %v540_v5, %v530_v12  ;;  %v541_v20 = vadd.f32 %v539_v6, %v529_v13 }
 0x154   : > { %v547_v9 = vpop.permute.xlu1 %546  ;;  %v545_v10 = vpop.permute.xlu0 %544 }
 0x155   : > { %v550_v16 = vmul.f32 %v548_v2, %v547_v9  ;;  %v549_v17 = vmul.f32 %v548_v2, %v545_v10 }
 0x156   : > { %876 = vrot.lane.b32.xlu1 %v2306_v7, %s1772_s26  ;;  %874 = vrot.lane.b32.xlu0 %v2308_v8, %s1772_s26 }
 0x157   : > { %v552_v27 = vadd.f32 %v550_v16, %v542_v19  ;;  %v551_v30 = vadd.f32 %v549_v17, %v541_v20  ;;  %v634_v16 = vmul.f32 %v632_v4, %v2140_v43 }
 0x158   : > { %v557_v24 = vpop.permute.xlu1 %556  ;;  %v555_v26 = vpop.permute.xlu0 %554 }
 0x159   : > { %v560_v33 = vmul.f32 %v558_v18, %v557_v24  ;;  %v559_v34 = vmul.f32 %v558_v18, %v555_v26  ;;  %v633_v18 = vmul.f32 %v632_v4, %v2142_v44  ;;  %v652_v44 = vstv %s1394_s7  ;;  %s1404_s7 = sld [smem:[#allocation9 + $0x32]] }
 0x15a   : > { %886 = vrot.lane.b32.xlu1 %v2306_v7, %s1771_s15  ;;  %884 = vrot.lane.b32.xlu0 %v2308_v8, %s1771_s15 }
 0x15b   : > { %v562_v41 = vadd.f32 %v560_v33, %v552_v27  ;;  %v561_v42 = vadd.f32 %v559_v34, %v551_v30  ;;  %v642_v30 = vstv %s2350_s4  ;;  %s1403_s4 = sld [smem:[#allocation9 + $0x31]] }
 0x15c   : > { %v573_v45 = vpop.permute.xlu1 %572  ;;  %v571_v46 = vpop.permute.xlu0 %570 }
 0x15d   : > { %v568_v39 = vadd.f32 %v566_v23, %v562_v41  ;;  %v567_v47 = vadd.f32 %v565_v25, %v561_v42  ;;  %v576_v52 = vmul.f32 %v574_v49, %v573_v45  ;;  %v575_v38 = vmul.f32 %v574_v49, %v571_v46 }
 0x15e   : > { %896 = vrot.lane.b32.xlu1 %v2306_v7, %s1773_s5  ;;  %894 = vrot.lane.b32.xlu0 %v2308_v8, %s1773_s5 }
 0x15f   : > { %v578_v36 = vadd.f32 %v576_v52, %v568_v39  ;;  %v577_v58 = vadd.f32 %v575_v38, %v567_v47 }
 0x160   : > { %v583_v40 = vpop.permute.xlu1 %582  ;;  %v581_v48 = vpop.permute.xlu0 %580 }
 0x161   : > { %v586_v54 = vmul.f32 %v584_v50, %v583_v40  ;;  %v585_v55 = vmul.f32 %v584_v50, %v581_v48  ;;  %v662_v48 = vstv %s1395_s21  ;;  %s2415_s21 = sld [smem:[#allocation9 + $0x33]] }
 0x162   : > { %912 = vrot.lane.b32.xlu1 %v2306_v7, %s1774_s12  ;;  %910 = vrot.lane.b32.xlu0 %v2308_v8, %s1774_s12 }
 0x163   : > { %v588_v31 = vadd.f32 %v586_v54, %v578_v36  ;;  %v587_v62 = vadd.f32 %v585_v55, %v577_v58  ;;  %v674_v55 = vstv %s1396_s29  ;;  %s1406_s29 = sld [smem:[#allocation9 + $0x34]] }
 0x164   : > { %v593_v51 = vpop.permute.xlu1 %592  ;;  %v591_v37 = vpop.permute.xlu0 %590 }
 0x165   : > { %v596_v59 = vmul.f32 %v594_v53, %v593_v51  ;;  %v595_v60 = vmul.f32 %v594_v53, %v591_v37 }
 0x166   : > { %922 = vrot.lane.b32.xlu1 %v2306_v7, %s1775_s3  ;;  %920 = vrot.lane.b32.xlu0 %v2308_v8, %s1775_s3 }
 0x167   : > { %v598_v5 = vadd.f32 %v596_v59, %v588_v31  ;;  %v597_v6 = vadd.f32 %v595_v60, %v587_v62  ;;  %v684_v60 = vstv %s2372_s25  ;;  %v2387_v62 = vld [vmem:[#allocation4 + $0x24] sm:$0xff]  ;;  %s2421_s25 = sld [smem:[#allocation9 + $0x35]] }
 0x168   : > { %v605_v35 = vpop.permute.xlu1 %604  ;;  %v603_v57 = vpop.permute.xlu0 %602 }
 0x169   : > { %v608_v32 = vmul.f32 %v606_v56, %v605_v35  ;;  %v607_v63 = vmul.f32 %v606_v56, %v603_v57 }
 0x16a   : > { %932 = vrot.lane.b32.xlu1 %v2306_v7, %s1776_s20  ;;  %930 = vrot.lane.b32.xlu0 %v2308_v8, %s1776_s20 }
 0x16b   : > { %v610_v12 = vadd.f32 %v608_v32, %v598_v5  ;;  %v609_v13 = vadd.f32 %v607_v63, %v597_v6  ;;  %v2389_v32 = vld [vmem:[#allocation4 + $0x1c] sm:$0xff]  ;;  %v694_v5 = vstv %s2378_s1  ;;  %v700_v6 = vstv %s1399_s22  ;;  %s1408_s1 = sld [smem:[#allocation9 + $0x36]]  ;;  %s1409_s22 = sld [smem:[#allocation9 + $0x37]] }
 0x16c   : > { %v615_v2 = vpop.permute.xlu1 %614  ;;  %v613_v3 = vpop.permute.xlu0 %612 }
 0x16d   : > { %v618_v9 = vmul.f32 %v616_v61, %v615_v2  ;;  %v617_v10 = vmul.f32 %v616_v61, %v613_v3 }
 0x16e   : > { %944 = vrot.lane.b32.xlu1 %v2345_v0, %s1772_s26  ;;  %942 = vrot.lane.b32.xlu0 %v2347_v1, %s1772_s26 }
 0x16f   : > { %v620_v20 = vadd.f32 %v618_v9, %v610_v12  ;;  %v619_v23 = vadd.f32 %v617_v10, %v609_v13  ;;  %v702_v13 = vmul.f32 %v700_v6, %v2189_v28 }
 0x170   : > { %v625_v17 = vpop.permute.xlu1 %624  ;;  %v623_v19 = vpop.permute.xlu0 %622 }
 0x171   : > { %v628_v24 = vmul.f32 %v626_v11, %v625_v17  ;;  %v627_v25 = vmul.f32 %v626_v11, %v623_v19  ;;  %v701_v17 = vmul.f32 %v700_v6, %v2191_v29  ;;  %v710_v19 = vstv %s2385_s24  ;;  %s1410_s24 = sld [smem:[#allocation9 + $0x38]] }
 0x172   : > { %954 = vrot.lane.b32.xlu1 %v2345_v0, %s1771_s15  ;;  %952 = vrot.lane.b32.xlu0 %v2347_v1, %s1771_s15  ;;  %v720_v29 = vstv %s1401_s28  ;;  %s2447_s28 = sld [smem:[#allocation9 + $0x39]] }
 0x173   : > { %v630_v26 = vadd.f32 %v628_v24, %v620_v20  ;;  %v629_v27 = vadd.f32 %v627_v25, %v619_v23 }
 0x174   : > { %v641_v33 = vpop.permute.xlu1 %640  ;;  %v639_v43 = vpop.permute.xlu0 %638 }
 0x175   : > { %v636_v34 = vadd.f32 %v634_v16, %v630_v26  ;;  %v635_v41 = vadd.f32 %v633_v18, %v629_v27  ;;  %v644_v42 = vmul.f32 %v642_v30, %v641_v33  ;;  %v643_v45 = vmul.f32 %v642_v30, %v639_v43 }
 0x176   : > { %964 = vrot.lane.b32.xlu1 %v2345_v0, %s1773_s5  ;;  %962 = vrot.lane.b32.xlu0 %v2347_v1, %s1773_s5 }
 0x177   : > { %v646_v49 = vadd.f32 %v644_v42, %v636_v34  ;;  %v645_v50 = vadd.f32 %v643_v45, %v635_v41  ;;  %v730_v45 = vstv %s1402_s8  ;;  %s2449_s8 = sld [smem:[#allocation9 + $0x3b]] }
 0x178   : > { %v651_v46 = vpop.permute.xlu1 %650  ;;  %v649_v39 = vpop.permute.xlu0 %648 }
 0x179   : > { %v654_v47 = vmul.f32 %v652_v44, %v651_v46  ;;  %v653_v40 = vmul.f32 %v652_v44, %v649_v39 }
 0x17a   : > { %980 = vrot.lane.b32.xlu1 %v2345_v0, %s1774_s12  ;;  %978 = vrot.lane.b32.xlu0 %v2347_v1, %s1774_s12 }
 0x17b   : > { %v656_v52 = vadd.f32 %v654_v47, %v646_v49  ;;  %v655_v38 = vadd.f32 %v653_v40, %v645_v50  ;;  %v742_v50 = vstv %s1403_s4  ;;  %s2455_s4 = sld [smem:[#allocation9 + $0x3a]] }
 0x17c   : > { %v661_v51 = vpop.permute.xlu1 %660  ;;  %v659_v37 = vpop.permute.xlu0 %658 }
 0x17d   : > { %v664_v53 = vmul.f32 %v662_v48, %v661_v51  ;;  %v663_v54 = vmul.f32 %v662_v48, %v659_v37 }
 0x17e   : > { %990 = vrot.lane.b32.xlu1 %v2345_v0, %s1775_s3  ;;  %988 = vrot.lane.b32.xlu0 %v2347_v1, %s1775_s3 }
 0x17f   : > { %v666_v56 = vadd.f32 %v664_v53, %v656_v52  ;;  %v665_v35 = vadd.f32 %v663_v54, %v655_v38 }
 0x180   : > { %v673_v57 = vpop.permute.xlu1 %672  ;;  %v671_v36 = vpop.permute.xlu0 %670 }
 0x181   : > { %v676_v58 = vmul.f32 %v674_v55, %v673_v57  ;;  %v675_v59 = vmul.f32 %v674_v55, %v671_v36  ;;  %v752_v55 = vstv %s1404_s7  ;;  %v2423_v57 = vld [vmem:[#allocation4 + $0x25] sm:$0xff]  ;;  %v2425_v36 = vld [vmem:[#allocation4 + $0x1d] sm:$0xff]  ;;  %s1415_s7 = sld [smem:[#allocation9 + $0x3d]] }
 0x182   : > { %1000 = vrot.lane.b32.xlu1 %v2345_v0, %s1776_s20  ;;  %998 = vrot.lane.b32.xlu0 %v2347_v1, %s1776_s20 }
 0x183   : > { %v678_v61 = vadd.f32 %v676_v58, %v666_v56  ;;  %v677_v31 = vadd.f32 %v675_v59, %v665_v35 }
 0x184   : > { %v683_v63 = vpop.permute.xlu1 %682  ;;  %v681_v2 = vpop.permute.xlu0 %680 }
 0x185   : > { %v686_v3 = vmul.f32 %v684_v60, %v683_v63  ;;  %v685_v4 = vmul.f32 %v684_v60, %v681_v2  ;;  %v768_v63 = vstv %s1406_s29  ;;  %s1417_s29 = sld [smem:[#allocation9 + $0x3f]] }
 0x186   : > { %1012 = vrot.lane.b32.xlu1 %v2387_v62, %s1772_s26  ;;  %1010 = vrot.lane.b32.xlu0 %v2389_v32, %s1772_s26  ;;  %v770_v6 = vmul.f32 %v768_v63, %v2228_v21 }
 0x187   : > { %v688_v9 = vadd.f32 %v686_v3, %v678_v61  ;;  %v687_v10 = vadd.f32 %v685_v4, %v677_v31  ;;  %v762_v31 = vstv %s2415_s21  ;;  %s1416_s21 = sld [smem:[#allocation9 + $0x3e]] }
 0x188   : > { %v693_v11 = vpop.permute.xlu1 %692  ;;  %v691_v12 = vpop.permute.xlu0 %690 }
 0x189   : > { %v696_v16 = vmul.f32 %v694_v5, %v693_v11  ;;  %v695_v18 = vmul.f32 %v694_v5, %v691_v12  ;;  %v778_v12 = vstv %s2421_s25  ;;  %s2488_s25 = sld [smem:[#allocation9 + $0x42]] }
 0x18a   : > { %1022 = vrot.lane.b32.xlu1 %v2387_v62, %s1771_s15  ;;  %1020 = vrot.lane.b32.xlu0 %v2389_v32, %s1771_s15 }
 0x18b   : > { %v698_v20 = vadd.f32 %v696_v16, %v688_v9  ;;  %v697_v23 = vadd.f32 %v695_v18, %v687_v10  ;;  %v769_v10 = vmul.f32 %v768_v63, %v2230_v22 }
 0x18c   : > { %v709_v24 = vpop.permute.xlu1 %708  ;;  %v707_v25 = vpop.permute.xlu0 %706 }
 0x18d   : > { %v704_v26 = vadd.f32 %v702_v13, %v698_v20  ;;  %v703_v27 = vadd.f32 %v701_v17, %v697_v23  ;;  %v712_v30 = vmul.f32 %v710_v19, %v709_v24  ;;  %v711_v28 = vmul.f32 %v710_v19, %v707_v25 }
 0x18e   : > { %1032 = vrot.lane.b32.xlu1 %v2387_v62, %s1773_s5  ;;  %1030 = vrot.lane.b32.xlu0 %v2389_v32, %s1773_s5 }
 0x18f   : > { %v714_v33 = vadd.f32 %v712_v30, %v704_v26  ;;  %v713_v43 = vadd.f32 %v711_v28, %v703_v27  ;;  %v788_v27 = vstv %s1408_s1  ;;  %s1424_s1 = sld [smem:[#allocation9 + $0x46]] }
 0x190   : > { %v719_v34 = vpop.permute.xlu1 %718  ;;  %v717_v41 = vpop.permute.xlu0 %716 }
 0x191   : > { %v722_v44 = vmul.f32 %v720_v29, %v719_v34  ;;  %v721_v42 = vmul.f32 %v720_v29, %v717_v41  ;;  %v798_v29 = vstv %s1409_s22  ;;  %v810_v34 = vstv %s1410_s24  ;;  %s1425_s22 = sld [smem:[#allocation9 + $0x47]]  ;;  %s2505_s24 = sld [smem:[#allocation9 + $0x49]] }
 0x192   : > { %1048 = vrot.lane.b32.xlu1 %v2387_v62, %s1774_s12  ;;  %1046 = vrot.lane.b32.xlu0 %v2389_v32, %s1774_s12 }
 0x193   : > { %v724_v46 = vadd.f32 %v722_v44, %v714_v33  ;;  %v723_v39 = vadd.f32 %v721_v42, %v713_v43 }
 0x194   : > { %v729_v47 = vpop.permute.xlu1 %728  ;;  %v727_v40 = vpop.permute.xlu0 %726 }
 0x195   : > { %v732_v48 = vmul.f32 %v730_v45, %v729_v47  ;;  %v731_v49 = vmul.f32 %v730_v45, %v727_v40 }
 0x196   : > { %1058 = vrot.lane.b32.xlu1 %v2387_v62, %s1775_s3  ;;  %1056 = vrot.lane.b32.xlu0 %v2389_v32, %s1775_s3 }
 0x197   : > { %v734_v51 = vadd.f32 %v732_v48, %v724_v46  ;;  %v733_v37 = vadd.f32 %v731_v49, %v723_v39  ;;  %v820_v46 = vstv %s2447_s28  ;;  %v2462_v49 = vld [vmem:[#allocation4 + $0x26] sm:$0xff]  ;;  %s2507_s28 = sld [smem:[#allocation9 + $0x48]] }
 0x198   : > { %v741_v52 = vpop.permute.xlu1 %740  ;;  %v739_v38 = vpop.permute.xlu0 %738 }
 0x199   : > { %v744_v53 = vmul.f32 %v742_v50, %v741_v52  ;;  %v743_v54 = vmul.f32 %v742_v50, %v739_v38  ;;  %v2464_v50 = vld [vmem:[#allocation4 + $0x1e] sm:$0xff]  ;;  %v836_v52 = vstv %s2449_s8  ;;  %s1428_s8 = sld [smem:[#allocation9 + $0x4a]] }
 0x19a   : > { %1068 = vrot.lane.b32.xlu1 %v2387_v62, %s1776_s20  ;;  %1066 = vrot.lane.b32.xlu0 %v2389_v32, %s1776_s20 }
 0x19b   : > { %v746_v56 = vadd.f32 %v744_v53, %v734_v51  ;;  %v745_v35 = vadd.f32 %v743_v54, %v733_v37 }
 0x19c   : > { %v751_v58 = vpop.permute.xlu1 %750  ;;  %v749_v59 = vpop.permute.xlu0 %748 }
 0x19d   : > { %v754_v60 = vmul.f32 %v752_v55, %v751_v58  ;;  %v753_v61 = vmul.f32 %v752_v55, %v749_v59  ;;  %v838_v59 = vmul.f32 %v836_v52, %v2267_v14 }
 0x19e   : > { %1080 = vrot.lane.b32.xlu1 %v2423_v57, %s1772_s26  ;;  %1078 = vrot.lane.b32.xlu0 %v2425_v36, %s1772_s26 }
 0x19f   : > { %v756_v2 = vadd.f32 %v754_v60, %v746_v56  ;;  %v755_v3 = vadd.f32 %v753_v61, %v745_v35  ;;  %v830_v56 = vstv %s2455_s4  ;;  %v837_v61 = vmul.f32 %v836_v52, %v2269_v15  ;;  %s1429_s4 = sld [smem:[#allocation9 + $0x4b]] }
 0x1a0   : > { %v761_v4 = vpop.permute.xlu1 %760  ;;  %v759_v5 = vpop.permute.xlu0 %758 }
 0x1a1   : > { %v764_v9 = vmul.f32 %v762_v31, %v761_v4  ;;  %v763_v11 = vmul.f32 %v762_v31, %v759_v5 }
 0x1a2   : > { %1090 = vrot.lane.b32.xlu1 %v2423_v57, %s1771_s15  ;;  %1088 = vrot.lane.b32.xlu0 %v2425_v36, %s1771_s15 }
 0x1a3   : > { %v766_v13 = vadd.f32 %v764_v9, %v756_v2  ;;  %v765_v16 = vadd.f32 %v763_v11, %v755_v3 }
 0x1a4   : > { %v777_v17 = vpop.permute.xlu1 %776  ;;  %v775_v18 = vpop.permute.xlu0 %774 }
 0x1a5   : > { %v772_v19 = vadd.f32 %v770_v6, %v766_v13  ;;  %v771_v20 = vadd.f32 %v769_v10, %v765_v16  ;;  %v780_v23 = vmul.f32 %v778_v12, %v777_v17  ;;  %v779_v21 = vmul.f32 %v778_v12, %v775_v18 }
 0x1a6   : > { %1100 = vrot.lane.b32.xlu1 %v2423_v57, %s1773_s5  ;;  %1098 = vrot.lane.b32.xlu0 %v2425_v36, %s1773_s5  ;;  %v856_v16 = vstv %s1415_s7  ;;  %s1431_s7 = sld [smem:[#allocation9 + $0x4d]] }
 0x1a7   : > { %v782_v22 = vadd.f32 %v780_v23, %v772_v19  ;;  %v781_v24 = vadd.f32 %v779_v21, %v771_v20  ;;  %v866_v23 = vstv %s1416_s21  ;;  %s1432_s21 = sld [smem:[#allocation9 + $0x4e]] }
 0x1a8   : > { %v787_v25 = vpop.permute.xlu1 %786  ;;  %v785_v26 = vpop.permute.xlu0 %784 }
 0x1a9   : > { %v790_v33 = vmul.f32 %v788_v27, %v787_v25  ;;  %v789_v43 = vmul.f32 %v788_v27, %v785_v26 }
 0x1aa   : > { %1116 = vrot.lane.b32.xlu1 %v2423_v57, %s1774_s12  ;;  %1114 = vrot.lane.b32.xlu0 %v2425_v36, %s1774_s12 }
 0x1ab   : > { %v792_v39 = vadd.f32 %v790_v33, %v782_v22  ;;  %v791_v47 = vadd.f32 %v789_v43, %v781_v24  ;;  %v878_v24 = vstv %s1417_s29  ;;  %s2513_s29 = sld [smem:[#allocation9 + $0x50]] }
 0x1ac   : > { %v797_v30 = vpop.permute.xlu1 %796  ;;  %v795_v28 = vpop.permute.xlu0 %794 }
 0x1ad   : > { %v800_v42 = vmul.f32 %v798_v29, %v797_v30  ;;  %v799_v45 = vmul.f32 %v798_v29, %v795_v28 }
 0x1ae   : > { %1126 = vrot.lane.b32.xlu1 %v2423_v57, %s1775_s3  ;;  %1124 = vrot.lane.b32.xlu0 %v2425_v36, %s1775_s3 }
 0x1af   : > { %v802_v38 = vadd.f32 %v800_v42, %v792_v39  ;;  %v801_v53 = vadd.f32 %v799_v45, %v791_v47 }
 0x1b0   : > { %v809_v41 = vpop.permute.xlu1 %808  ;;  %v807_v44 = vpop.permute.xlu0 %806 }
 0x1b1   : > { %v812_v40 = vmul.f32 %v810_v34, %v809_v41  ;;  %v811_v48 = vmul.f32 %v810_v34, %v807_v44 }
 0x1b2   : > { %1136 = vrot.lane.b32.xlu1 %v2423_v57, %s1776_s20  ;;  %1134 = vrot.lane.b32.xlu0 %v2425_v36, %s1776_s20 }
 0x1b3   : > { %v814_v35 = vadd.f32 %v812_v40, %v802_v38  ;;  %v813_v58 = vadd.f32 %v811_v48, %v801_v53 }
 0x1b4   : > { %v819_v51 = vpop.permute.xlu1 %818  ;;  %v817_v37 = vpop.permute.xlu0 %816 }
 0x1b5   : > { %v822_v54 = vmul.f32 %v820_v46, %v819_v51  ;;  %v821_v55 = vmul.f32 %v820_v46, %v817_v37  ;;  %v904_v46 = vstv %s2488_s25  ;;  %s1435_s25 = sld [smem:[#allocation9 + $0x51]] }
 0x1b6   : > { %1148 = vrot.lane.b32.xlu1 %v2462_v49, %s1772_s26  ;;  %1146 = vrot.lane.b32.xlu0 %v2464_v50, %s1772_s26  ;;  %s1414_s26 = sld [smem:[#allocation9 + $0x3c]] }
 0x1b7   : > { %v824_v63 = vadd.f32 %v822_v54, %v814_v35  ;;  %v823_v2 = vadd.f32 %v821_v55, %v813_v58  ;;  %v906_v54 = vmul.f32 %v904_v46, %v2306_v7  ;;  %v905_v55 = vmul.f32 %v904_v46, %v2308_v8 }
 0x1b8   : > { %v829_v60 = vpop.permute.xlu1 %828  ;;  %v827_v31 = vpop.permute.xlu0 %826 }
 0x1b9   : > { %v832_v3 = vmul.f32 %v830_v56, %v829_v60  ;;  %v831_v4 = vmul.f32 %v830_v56, %v827_v31 }
 0x1ba   : > { %1158 = vrot.lane.b32.xlu1 %v2462_v49, %s1771_s15  ;;  %1156 = vrot.lane.b32.xlu0 %v2464_v50, %s1771_s15  ;;  %s2486_s15 = sld [smem:[#allocation9 + $0x40]] }
 0x1bb   : > { %v834_v5 = vadd.f32 %v832_v3, %v824_v63  ;;  %v833_v6 = vadd.f32 %v831_v4, %v823_v2 }
 0x1bc   : > { %v845_v9 = vpop.permute.xlu1 %844  ;;  %v843_v10 = vpop.permute.xlu0 %842  ;;  %v846_v13 = vstv %s1414_s26  ;;  %s1430_s26 = sld [smem:[#allocation9 + $0x4c]] }
 0x1bd   : > { %v840_v14 = vadd.f32 %v838_v59, %v834_v5  ;;  %v839_v11 = vadd.f32 %v837_v61, %v833_v6  ;;  %v848_v19 = vmul.f32 %v846_v13, %v845_v9  ;;  %v847_v20 = vmul.f32 %v846_v13, %v843_v10 }
 0x1be   : > { %1168 = vrot.lane.b32.xlu1 %v2462_v49, %s1773_s5  ;;  %1166 = vrot.lane.b32.xlu0 %v2464_v50, %s1773_s5  ;;  %s2494_s5 = sld [smem:[#allocation9 + $0x41]]  ;;  %v946_v13 = vstv %s1424_s1  ;;  %s2521_s1 = sld [smem:[#allocation9 + $0x57]] }
 0x1bf   : > { %v850_v27 = vadd.f32 %v848_v19, %v840_v14  ;;  %v849_v30 = vadd.f32 %v847_v20, %v839_v11 }
 0x1c0   : > { %v855_v15 = vpop.permute.xlu1 %854  ;;  %v853_v12 = vpop.permute.xlu0 %852  ;;  %v888_v33 = vstv %s2486_s15  ;;  %s2515_s15 = sld [smem:[#allocation9 + $0x4f]] }
 0x1c1   : > { %v858_v21 = vmul.f32 %v856_v16, %v855_v15  ;;  %v857_v22 = vmul.f32 %v856_v16, %v853_v12 }
 0x1c2   : > { %1184 = vrot.lane.b32.xlu1 %v2462_v49, %s1774_s12  ;;  %1182 = vrot.lane.b32.xlu0 %v2464_v50, %s1774_s12  ;;  %s1421_s12 = sld [smem:[#allocation9 + $0x43]] }
 0x1c3   : > { %v860_v43 = vadd.f32 %v858_v21, %v850_v27  ;;  %v859_v34 = vadd.f32 %v857_v22, %v849_v30  ;;  %v956_v21 = vstv %s1425_s22  ;;  %s2523_s22 = sld [smem:[#allocation9 + $0x56]] }
 0x1c4   : > { %v865_v17 = vpop.permute.xlu1 %864  ;;  %v863_v18 = vpop.permute.xlu0 %862  ;;  %v898_v51 = vstv %s2494_s5  ;;  %s1436_s5 = sld [smem:[#allocation9 + $0x52]] }
 0x1c5   : > { %v868_v28 = vmul.f32 %v866_v23, %v865_v17  ;;  %v867_v29 = vmul.f32 %v866_v23, %v863_v18 }
 0x1c6   : > { %1194 = vrot.lane.b32.xlu1 %v2462_v49, %s1775_s3  ;;  %1192 = vrot.lane.b32.xlu0 %v2464_v50, %s1775_s3  ;;  %s1422_s3 = sld [smem:[#allocation9 + $0x44]] }
 0x1c7   : > { %v870_v39 = vadd.f32 %v868_v28, %v860_v43  ;;  %v869_v47 = vadd.f32 %v867_v29, %v859_v34  ;;  %v972_v28 = vstv %s2505_s24  ;;  %s1442_s24 = sld [smem:[#allocation9 + $0x58]] }
 0x1c8   : > { %v877_v25 = vpop.permute.xlu1 %876  ;;  %v875_v26 = vpop.permute.xlu0 %874  ;;  %v914_v6 = vstv %s1421_s12  ;;  %s1437_s12 = sld [smem:[#allocation9 + $0x53]] }
 0x1c9   : > { %v880_v41 = vmul.f32 %v878_v24, %v877_v25  ;;  %v879_v44 = vmul.f32 %v878_v24, %v875_v26 }
 0x1ca   : > { %1204 = vrot.lane.b32.xlu1 %v2462_v49, %s1776_s20  ;;  %1202 = vrot.lane.b32.xlu0 %v2464_v50, %s1776_s20  ;;  %s1423_s20 = sld [smem:[#allocation9 + $0x45]] }
 0x1cb   : > { %v882_v37 = vadd.f32 %v880_v41, %v870_v39  ;;  %v881_v52 = vadd.f32 %v879_v44, %v869_v47  ;;  %v966_v41 = vstv %s2507_s28  ;;  %v974_v39 = vmul.f32 %v972_v28, %v2345_v0  ;;  %s1443_s28 = sld [smem:[#allocation9 + $0x59]] }
 0x1cc   : > { %v887_v42 = vpop.permute.xlu1 %886  ;;  %v885_v45 = vpop.permute.xlu0 %884  ;;  %v924_v7 = vstv %s1422_s3  ;;  %v973_v47 = vmul.f32 %v972_v28, %v2347_v1  ;;  %v992_v0 = vstv %s1429_s4  ;;  %s1438_s3 = sld [smem:[#allocation9 + $0x54]]  ;;  %s1445_s4 = sld [smem:[#allocation9 + $0x5b]] }
 0x1cd   : > { %v890_v40 = vmul.f32 %v888_v33, %v887_v42  ;;  %v889_v48 = vmul.f32 %v888_v33, %v885_v45 }
 0x1cf   : > { %v892_v56 = vadd.f32 %v890_v40, %v882_v37  ;;  %v891_v35 = vadd.f32 %v889_v48, %v881_v52 }
 0x1d0   : > { %v897_v38 = vpop.permute.xlu1 %896  ;;  %v895_v53 = vpop.permute.xlu0 %894  ;;  %v934_v11 = vstv %s1423_s20  ;;  %s1439_s20 = sld [smem:[#allocation9 + $0x55]] }
 0x1d1   : > { %v900_v58 = vmul.f32 %v898_v51, %v897_v38  ;;  %v899_v59 = vmul.f32 %v898_v51, %v895_v53 }
 0x1d3   : > { %v902_v60 = vadd.f32 %v900_v58, %v892_v56  ;;  %v901_v61 = vadd.f32 %v899_v59, %v891_v35  ;;  %v982_v59 = vstv %s1428_s8  ;;  %s1444_s8 = sld [smem:[#allocation9 + $0x5a]] }
 0x1d4   : > { %v913_v31 = vpop.permute.xlu1 %912  ;;  %v911_v63 = vpop.permute.xlu0 %910 }
 0x1d5   : > { %v908_v2 = vadd.f32 %v906_v54, %v902_v60  ;;  %v907_v3 = vadd.f32 %v905_v55, %v901_v61  ;;  %v916_v10 = vmul.f32 %v914_v6, %v913_v31  ;;  %v915_v14 = vmul.f32 %v914_v6, %v911_v63 }
 0x1d6   : > { %v1002_v63 = vstv %s1430_s26  ;;  %s1446_s26 = sld [smem:[#allocation9 + $0x5c]] }
 0x1d7   : > { %v918_v18 = vadd.f32 %v916_v10, %v908_v2  ;;  %v917_v19 = vadd.f32 %v915_v14, %v907_v3  ;;  %v1024_v14 = vstv %s1432_s21  ;;  %s2531_s21 = sld [smem:[#allocation9 + $0x5d]] }
 0x1d8   : > { %v923_v4 = vpop.permute.xlu1 %922  ;;  %v921_v5 = vpop.permute.xlu0 %920 }
 0x1d9   : > { %v926_v15 = vmul.f32 %v924_v7, %v923_v4  ;;  %v925_v12 = vmul.f32 %v924_v7, %v921_v5  ;;  %v1014_v4 = vstv %s1431_s7  ;;  %s2529_s7 = sld [smem:[#allocation9 + $0x5e]] }
 0x1db   : > { %v928_v22 = vadd.f32 %v926_v15, %v918_v18  ;;  %v927_v24 = vadd.f32 %v925_v12, %v917_v19  ;;  %v1040_v18 = vstv %s2513_s29  ;;  %s1449_s29 = sld [smem:[#allocation9 + $0x5f]] }
 0x1dc   : > { %v933_v8 = vpop.permute.xlu1 %932  ;;  %v931_v9 = vpop.permute.xlu0 %930  ;;  %v1041_v28 = vmul.f32 %v1040_v18, %v2389_v32 }
 0x1dd   : > { %v936_v20 = vmul.f32 %v934_v11, %v933_v8  ;;  %v935_v23 = vmul.f32 %v934_v11, %v931_v9 }
 0x1df   : > { %v938_v29 = vadd.f32 %v936_v20, %v928_v22  ;;  %v937_v33 = vadd.f32 %v935_v23, %v927_v24  ;;  %v1034_v22 = vstv %s2515_s15  ;;  %s1450_s15 = sld [smem:[#allocation9 + $0x60]] }
 0x1e0   : > { %v945_v16 = vpop.permute.xlu1 %944  ;;  %v943_v17 = vpop.permute.xlu0 %942 }
 0x1e1   : > { %v948_v25 = vmul.f32 %v946_v13, %v945_v16  ;;  %v947_v26 = vmul.f32 %v946_v13, %v943_v17 }
 0x1e3   : > { %v950_v44 = vadd.f32 %v948_v25, %v938_v29  ;;  %v949_v42 = vadd.f32 %v947_v26, %v937_v33 }
 0x1e4   : > { %v955_v27 = vpop.permute.xlu1 %954  ;;  %v953_v30 = vpop.permute.xlu0 %952 }
 0x1e5   : > { %v958_v43 = vmul.f32 %v956_v21, %v955_v27  ;;  %v957_v34 = vmul.f32 %v956_v21, %v953_v30  ;;  %v1042_v30 = vmul.f32 %v1040_v18, %v2387_v62  ;;  %v1060_v62 = vstv %s1436_s5 }
 0x1e7   : > { %v960_v40 = vadd.f32 %v958_v43, %v950_v44  ;;  %v959_v48 = vadd.f32 %v957_v34, %v949_v42 }
 0x1e8   : > { %v965_v45 = vpop.permute.xlu1 %964  ;;  %v963_v46 = vpop.permute.xlu0 %962 }
 0x1e9   : > { %v968_v51 = vmul.f32 %v966_v41, %v965_v45  ;;  %v967_v37 = vmul.f32 %v966_v41, %v963_v46 }
 0x1eb   : > { %v970_v52 = vadd.f32 %v968_v51, %v960_v40  ;;  %v969_v38 = vadd.f32 %v967_v37, %v959_v48  ;;  %v1050_v48 = vstv %s1435_s25  ;;  %s1451_s25 = sld [smem:[#allocation9 + $0x61]] }
 0x1ec   : > { %v981_v53 = vpop.permute.xlu1 %980  ;;  %v979_v54 = vpop.permute.xlu0 %978 }
 0x1ed   : > { %v976_v55 = vadd.f32 %v974_v39, %v970_v52  ;;  %v975_v56 = vadd.f32 %v973_v47, %v969_v38  ;;  %v984_v61 = vmul.f32 %v982_v59, %v981_v53  ;;  %v983_v31 = vmul.f32 %v982_v59, %v979_v54 }
 0x1ee   : > { %v1070_v38 = vstv %s1437_s12 }
 0x1ef   : > { %v986_v7 = vadd.f32 %v984_v61, %v976_v55  ;;  %v985_v8 = vadd.f32 %v983_v31, %v975_v56  ;;  %v1082_v55 = vstv %s1438_s3 }
 0x1f0   : > { %v991_v35 = vpop.permute.xlu1 %990  ;;  %v989_v58 = vpop.permute.xlu0 %988 }
 0x1f1   : > { %v994_v2 = vmul.f32 %v992_v0, %v991_v35  ;;  %v993_v3 = vmul.f32 %v992_v0, %v989_v58 }
 0x1f3   : > { %v996_v11 = vadd.f32 %v994_v2, %v986_v7  ;;  %v995_v15 = vadd.f32 %v993_v3, %v985_v8 }
 0x1f4   : > { %v1001_v1 = vpop.permute.xlu1 %1000  ;;  %v999_v60 = vpop.permute.xlu0 %998 }
 0x1f5   : > { %v1004_v9 = vmul.f32 %v1002_v63, %v1001_v1  ;;  %v1003_v10 = vmul.f32 %v1002_v63, %v999_v60  ;;  %v1092_v60 = vstv %s1439_s20 }
 0x1f7   : > { %v1006_v19 = vadd.f32 %v1004_v9, %v996_v11  ;;  %v1005_v20 = vadd.f32 %v1003_v10, %v995_v15  ;;  %v1102_v10 = vstv %s2523_s22 }
 0x1f8   : > { %v1013_v5 = vpop.permute.xlu1 %1012  ;;  %v1011_v6 = vpop.permute.xlu0 %1010 }
 0x1f9   : > { %v1016_v12 = vmul.f32 %v1014_v4, %v1013_v5  ;;  %v1015_v13 = vmul.f32 %v1014_v4, %v1011_v6  ;;  %v1108_v5 = vstv %s2521_s1 }
 0x1fb   : > { %v1018_v24 = vadd.f32 %v1016_v12, %v1006_v19  ;;  %v1017_v25 = vadd.f32 %v1015_v13, %v1005_v20  ;;  %v1110_v13 = vmul.f32 %v1108_v5, %v2423_v57  ;;  %v1128_v57 = vstv %s1443_s28 }
 0x1fc   : > { %v1023_v16 = vpop.permute.xlu1 %1022  ;;  %v1021_v17 = vpop.permute.xlu0 %1020 }
 0x1fd   : > { %v1026_v23 = vmul.f32 %v1024_v14, %v1023_v16  ;;  %v1025_v21 = vmul.f32 %v1024_v14, %v1021_v17  ;;  %v1109_v16 = vmul.f32 %v1108_v5, %v2425_v36 }
 0x1ff   : > { %v1028_v29 = vadd.f32 %v1026_v23, %v1018_v24  ;;  %v1027_v33 = vadd.f32 %v1025_v21, %v1017_v25 }
 0x200   : > { %v1033_v26 = vpop.permute.xlu1 %1032  ;;  %v1031_v27 = vpop.permute.xlu0 %1030 }
 0x201   : > { %v1036_v43 = vmul.f32 %v1034_v22, %v1033_v26  ;;  %v1035_v34 = vmul.f32 %v1034_v22, %v1031_v27 }
 0x203   : > { %v1038_v41 = vadd.f32 %v1036_v43, %v1028_v29  ;;  %v1037_v44 = vadd.f32 %v1035_v34, %v1027_v33  ;;  %v1138_v34 = vstv %s1444_s8 }
 0x204   : > { %v1049_v42 = vpop.permute.xlu1 %1048  ;;  %v1047_v45 = vpop.permute.xlu0 %1046 }
 0x205   : > { %v1044_v46 = vadd.f32 %v1042_v30, %v1038_v41  ;;  %v1043_v39 = vadd.f32 %v1041_v28, %v1037_v44  ;;  %v1052_v37 = vmul.f32 %v1050_v48, %v1049_v42  ;;  %v1051_v52 = vmul.f32 %v1050_v48, %v1047_v45 }
 0x206   : > { %v1118_v28 = vstv %s1442_s24  ;;  %v1150_v42 = vstv %s1445_s4 }
 0x207   : > { %v1054_v58 = vadd.f32 %v1052_v37, %v1044_v46  ;;  %v1053_v59 = vadd.f32 %v1051_v52, %v1043_v39 }
 0x208   : > { %v1059_v47 = vpop.permute.xlu1 %1058  ;;  %v1057_v40 = vpop.permute.xlu0 %1056 }
 0x209   : > { %v1062_v53 = vmul.f32 %v1060_v62, %v1059_v47  ;;  %v1061_v54 = vmul.f32 %v1060_v62, %v1057_v40  ;;  %v1160_v62 = vstv %s1446_s26 }
 0x20b   : > { %v1064_v61 = vadd.f32 %v1062_v53, %v1054_v58  ;;  %v1063_v31 = vadd.f32 %v1061_v54, %v1053_v59  ;;  %v1176_v54 = vstv %s2529_s7  ;;  %v1170_v59 = vstv %s2531_s21 }
 0x20c   : > { %v1069_v32 = vpop.permute.xlu1 %1068  ;;  %v1067_v51 = vpop.permute.xlu0 %1066 }
 0x20d   : > { %v1072_v0 = vmul.f32 %v1070_v38, %v1069_v32  ;;  %v1071_v1 = vmul.f32 %v1070_v38, %v1067_v51 }
 0x20f   : > { %v1074_v6 = vadd.f32 %v1072_v0, %v1064_v61  ;;  %v1073_v7 = vadd.f32 %v1071_v1, %v1063_v31  ;;  %v1178_v31 = vmul.f32 %v1176_v54, %v2462_v49 }
 0x210   : > { %v1081_v56 = vpop.permute.xlu1 %1080  ;;  %v1079_v35 = vpop.permute.xlu0 %1078 }
 0x211   : > { %v1084_v63 = vmul.f32 %v1082_v55, %v1081_v56  ;;  %v1083_v2 = vmul.f32 %v1082_v55, %v1079_v35 }
 0x213   : > { %v1086_v14 = vadd.f32 %v1084_v63, %v1074_v6  ;;  %v1085_v11 = vadd.f32 %v1083_v2, %v1073_v7  ;;  %v1177_v63 = vmul.f32 %v1176_v54, %v2464_v50  ;;  %v1206_v50 = vstv %s1451_s25 }
 0x214   : > { %v1091_v3 = vpop.permute.xlu1 %1090  ;;  %v1089_v4 = vpop.permute.xlu0 %1088 }
 0x215   : > { %v1094_v8 = vmul.f32 %v1092_v60, %v1091_v3  ;;  %v1093_v9 = vmul.f32 %v1092_v60, %v1089_v4 }
 0x217   : > { %v1096_v17 = vadd.f32 %v1094_v8, %v1086_v14  ;;  %v1095_v18 = vadd.f32 %v1093_v9, %v1085_v11  ;;  %v1186_v8 = vstv %s1449_s29 }
 0x218   : > { %v1101_v15 = vpop.permute.xlu1 %1100  ;;  %v1099_v12 = vpop.permute.xlu0 %1098 }
 0x219   : > { %v1104_v19 = vmul.f32 %v1102_v10, %v1101_v15  ;;  %v1103_v20 = vmul.f32 %v1102_v10, %v1099_v12  ;;  %v1196_v15 = vstv %s1450_s15 }
 0x21b   : > { %v1106_v23 = vadd.f32 %v1104_v19, %v1096_v17  ;;  %v1105_v21 = vadd.f32 %v1103_v20, %v1095_v18 }
 0x21c   : > { %v1117_v22 = vpop.permute.xlu1 %1116  ;;  %v1115_v24 = vpop.permute.xlu0 %1114 }
 0x21d   : > { %v1112_v25 = vadd.f32 %v1110_v13, %v1106_v23  ;;  %v1111_v26 = vadd.f32 %v1109_v16, %v1105_v21  ;;  %v1120_v33 = vmul.f32 %v1118_v28, %v1117_v22  ;;  %v1119_v43 = vmul.f32 %v1118_v28, %v1115_v24 }
 0x21f   : > { %v1122_v39 = vadd.f32 %v1120_v33, %v1112_v25  ;;  %v1121_v47 = vadd.f32 %v1119_v43, %v1111_v26 }
 0x220   : > { %v1127_v27 = vpop.permute.xlu1 %1126  ;;  %v1125_v30 = vpop.permute.xlu0 %1124 }
 0x221   : > { %v1130_v41 = vmul.f32 %v1128_v57, %v1127_v27  ;;  %v1129_v44 = vmul.f32 %v1128_v57, %v1125_v30 }
 0x223   : > { %v1132_v32 = vadd.f32 %v1130_v41, %v1122_v39  ;;  %v1131_v51 = vadd.f32 %v1129_v44, %v1121_v47 }
 0x224   : > { %v1137_v36 = vpop.permute.xlu1 %1136  ;;  %v1135_v29 = vpop.permute.xlu0 %1134 }
 0x225   : > { %v1140_v40 = vmul.f32 %v1138_v34, %v1137_v36  ;;  %v1139_v48 = vmul.f32 %v1138_v34, %v1135_v29 }
 0x227   : > { %v1142_v55 = vadd.f32 %v1140_v40, %v1132_v32  ;;  %v1141_v56 = vadd.f32 %v1139_v48, %v1131_v51 }
 0x228   : > { %v1149_v45 = vpop.permute.xlu1 %1148  ;;  %v1147_v46 = vpop.permute.xlu0 %1146 }
 0x229   : > { %v1152_v37 = vmul.f32 %v1150_v42, %v1149_v45  ;;  %v1151_v52 = vmul.f32 %v1150_v42, %v1147_v46 }
 0x22b   : > { %v1154_v0 = vadd.f32 %v1152_v37, %v1142_v55  ;;  %v1153_v1 = vadd.f32 %v1151_v52, %v1141_v56 }
 0x22c   : > { %v1159_v38 = vpop.permute.xlu1 %1158  ;;  %v1157_v53 = vpop.permute.xlu0 %1156 }
 0x22d   : > { %v1162_v35 = vmul.f32 %v1160_v62, %v1159_v38  ;;  %v1161_v58 = vmul.f32 %v1160_v62, %v1157_v53 }
 0x22f   : > { %v1164_v2 = vadd.f32 %v1162_v35, %v1154_v0  ;;  %v1163_v3 = vadd.f32 %v1161_v58, %v1153_v1 }
 0x230   : > { %v1169_v60 = vpop.permute.xlu1 %1168  ;;  %v1167_v61 = vpop.permute.xlu0 %1166 }
 0x231   : > { %v1172_v4 = vmul.f32 %v1170_v59, %v1169_v60  ;;  %v1171_v5 = vmul.f32 %v1170_v59, %v1167_v61 }
 0x233   : > { %v1174_v6 = vadd.f32 %v1172_v4, %v1164_v2  ;;  %v1173_v7 = vadd.f32 %v1171_v5, %v1163_v3 }
 0x234   : > { %v1185_v9 = vpop.permute.xlu1 %1184  ;;  %v1183_v10 = vpop.permute.xlu0 %1182 }
 0x235   : > { %v1180_v14 = vadd.f32 %v1178_v31, %v1174_v6  ;;  %v1179_v11 = vadd.f32 %v1177_v63, %v1173_v7  ;;  %v1188_v12 = vmul.f32 %v1186_v8, %v1185_v9  ;;  %v1187_v13 = vmul.f32 %v1186_v8, %v1183_v10 }
 0x237   : > { %v1190_v19 = vadd.f32 %v1188_v12, %v1180_v14  ;;  %v1189_v20 = vadd.f32 %v1187_v13, %v1179_v11 }
 0x238   : > { %v1195_v16 = vpop.permute.xlu1 %1194  ;;  %v1193_v17 = vpop.permute.xlu0 %1192 }
 0x239   : > { %v1198_v49 = vmul.f32 %v1196_v15, %v1195_v16  ;;  %v1197_v18 = vmul.f32 %v1196_v15, %v1193_v17 }
 0x23b   : > { %v1200_v22 = vadd.f32 %v1198_v49, %v1190_v19  ;;  %v1199_v24 = vadd.f32 %v1197_v18, %v1189_v20 }
 0x23c   : > { %v1205_v23 = vpop.permute.xlu1 %1204  ;;  %v1203_v21 = vpop.permute.xlu0 %1202 }
 0x23d   : > { %v1208_v25 = vmul.f32 %v1206_v50, %v1205_v23  ;;  %v1207_v26 = vmul.f32 %v1206_v50, %v1203_v21 }
 0x23f   : > { %v1210_v27 = vadd.f32 %v1208_v25, %v1200_v22  ;;  %v1209_v30 = vadd.f32 %v1207_v26, %v1199_v24 }
 0x241   : > { %v1453_v28 = vmul.f32 -1.442695, %v1210_v27  ;;  %v1452_v57 = vmul.f32 -1.442695, %v1209_v30 }
 0x243   : > { %1585 = vpow2.f32 %v1453_v28 }
 0x244   : > { %1587 = vpow2.f32 %v1452_v57 }
 0x24d   : > { %v1586_v36 = vpop.eup %1585 }
 0x24e   : > { %v1588_v29 = vpop.eup %1587  ;;  %v1218_v33 = vadd.f32 1.0, %v1586_v36 }
 0x24f   : > { %v1217_v43 = vadd.f32 1.0, %v1588_v29 }
 0x250   : > { %1589 = vrcp.f32 %v1218_v33 }
 0x251   : > { %1591 = vrcp.f32 %v1217_v43 }
 0x25a   : > { %v1590_v34 = vpop.eup %1589 }
 0x25b   : > { %v1592_v41 = vpop.eup %1591  ;;  %1224 = vst.msk [vmem:[%s1983_s23 + $0x8] sm:$0xff] %vm198_vm0, %v1590_v34 }
 0x25c   : > { %1223 = vst.msk [vmem:[%s1983_s23] sm:$0xff] %vm198_vm0, %v1592_v41 }
 0x25d PF: > { %s1460_s5 = sshll.u32 %s1752_s16, 8  ;;  %s1239_s1 = sshll.u32 %s1983_s23, 4  ;;  %s2548_s1 = int_to_ptr.vmem [resolvable:$true] %s1239_s1 }
 0x25e   : > { %s2545_s20 = scalar_lea.hbm %s2615_s2, %s1460_s5  ;;  %s2552_s22 = scalar_lea.sflag [#allocation7], %s190_s17 }
 0x25f   : > { %s1638_s24 = scalar_lea.vmem %s2548_s1, 256  ;;  %p2640_p6 = scmp.ne.s32.totalorder %s2628_s27, 0 }
 0x260   : > { %p1639_p4 = scmp.ne.s32.totalorder %s2548_s1, %s1638_s24  ;;  %s1777_s16 = smov [#allocation10]  }
 0x261   : > { %s1642_s28 = sshll.u32 %s1777_s16, 4  ;;  %s1643_s28 = int_to_ptr.vmem [resolvable:$false] %s1642_s28 }
 0x262   : > { %p1640_p10 = pnand %p1639_p4, %p2640_p6  ;;  %s1644_s8 = scalar_lea.vmem %s1643_s28, 512 }
 0x263   : > { %p1645_p0 = scmp.lt.s32.totalorder %s2548_s1, %s1643_s28  ;;  %p1646_p2 = scmp.lt.s32.totalorder %s1644_s8, %s1638_s24 }
 0x264   : > { %p1641_p12 = pneg %p1640_p10 }
 0x265   : > { %p1647_p8 = por %p1646_p2, %p1645_p0 }
 0x267   : > { %p1648_p9 = pnand %p1647_p8, %p1641_p12 }
 0x269   : > { %1651 = shalt.err (!%p1648_p9)
}
 0x26a   : > { %s1652_s17 = scalar_lea.hbm %s2545_s20, 256  ;;  %s1656_s26 = scalar_lea.hbm %s2615_s2, 512 }
 0x26b   : > { %p1653_p11 = scmp.ne.s32.totalorder %s2545_s20, %s1652_s17  ;;  %p1657_p3 = scmp.lt.u32.totalorder %s2545_s20, %s2615_s2 }
 0x26c   : > { %p1658_p7 = scmp.lt.u32.totalorder %s1656_s26, %s1652_s17  ;;  %p1660_p4 = scmp.lt.u32.totalorder %s1652_s17, %s2545_s20 }
 0x26d   : > { %p1654_p1 = pnand %p1653_p11, %p2640_p6 }
 0x26e   : > { %p1659_p13 = por %p1658_p7, %p1657_p3 }
 0x26f   : > { %p1655_p5 = pneg %p1654_p1 }
 0x270   : > { %p1661_p10 = por %p1660_p4, %p1659_p13 }
 0x272   : > { %p1662_p12 = pnand %p1661_p10, %p1655_p5 }
 0x274   : > { %1665 = shalt.err (!%p1662_p12)
}
 0x275   : > { %s1778_s29 = smov 128   ;;  %s1779_s15 = smov 8  }
 0x276   : > { %1467 = dma.vmem_to_hbm [thread:$0]  (%p2640_p6), %s2548_s1, 256, %s2545_s20, %s2552_s22, %s1778_s29, %s1778_s29, %s1779_s15  }
 0x277 PF: > { %s2641_s25 = sld [smem:[#allocation15_spill]]  ;;  %p1484_p0 = scmp.ge.s32.totalorder %s1764_s19, 2 }
 0x278   : > { %s1254_s5 = sand.u32 1, %s1724_s9  }
 0x279   : > { %s1255_s12 = scalar_lea.sflag [#allocation7], %s1254_s5 }
 0x27d   : > { %p2642_p2 = scmp.ne.s32.totalorder %s2641_s25, 0 }
 0x27f   : > { %p1478_p8 = pnand %p1484_p0, %p2642_p2 }
 0x281   : > { %1719 = dma.done.wait (!%p1478_p8), %s1255_s12, 256  }
 0x282   : > { %1721 = vsyncadd (!%p1478_p8), %s1255_s12, 4294967040  ;;  %s19_s19 = sadd.s32 1, %s1764_s19   ;;  %s2643_s15 = sld [smem:[#allocation14_spill]] }
 0x283   : > { %p16_p9 = scmp.ge.s32.totalorder %s19_s19, 10   ;;  %s2644_s17 = sld [smem:[#allocation16_spill]] }
 0x284   : > { %s2645_s27 = sld [smem:[#allocation17_spill]]  ;;  %s2646_s9 = smov %s1728_s10 }
 0x285   : > { %s2647_s10 = smov %s1732_s11  ;;  %s2648_s11 = smov %s1926_s6 }
 0x286   : > { %s2649_s12 = smov %s1740_s13  ;;  %s2650_s13 = smov %s1744_s14 }
 0x287   : > { %s2651_s14 = smov %s1931_s30  ;;  %s2652_s16 = smov %s1760_s18 }
 0x288   :  { %18 = sbr.rel (!%p16_p9) target bundleno = 12 (0xc), region = 91 }
 0x28a   : > { %s2653_s18 = smov %s2645_s27 }
 0x28f   :  { %1260 = vsyncpa [#allocation6], 1 }
 0x290   :  { %1262 = vsyncpa [#allocation6 + $0x1], 1 }
 0x291   :  { %1263 = vsyncpa [#allocation7], 1 }
 0x292   :  { %1265 = vsyncpa [#allocation7 + $0x1], 1 }
 0x293   :  { %1266 = vsyncpa [#allocation8], 1 }
 0x294   :  { %1268 = vsyncpa [#allocation8 + $0x1], 1 }

</bundles_post_ra>
